<compile_context>
chip_gen: v6e
topology: v6e:2x2x1
jax: 0.10.0
libtpu: 0.0.40
codegen_flags: <defaults>
</compile_context>

<pallas_src>
import functools
import math

import jax
import jax.numpy as jnp
from jax import lax
from jax.experimental import pallas as pl
from jax.experimental.pallas import tpu as pltpu

_NEG_INIT = -1e30   # finite "minus infinity" for the running-max init (avoids inf-inf NaNs)
_STAT_LANES = 128   # lane-replicated running-stat width (one full lane group)


def _bcast_minor(x, n):
    """Broadcast a lane-replicated (..., r) array to (..., n) along the minor (lane) dim."""
    r = x.shape[-1]
    if n == r:
        return x
    if n < r:
        return x[..., :n]
    if n % r == 0:
        return jnp.concatenate([x] * (n // r), axis=-1)
    return jnp.broadcast_to(x[..., :1], x.shape[:-1] + (n,))


def _flash_attention_kernel(*refs, scale, mask_flag, masked_bias, num_heads):
    if mask_flag:
        q_ref, k_ref, v_ref, m_ref, o_ref, m_sc, l_sc, acc_sc = refs
    else:
        q_ref, k_ref, v_ref, o_ref, m_sc, l_sc, acc_sc = refs
        m_ref = None

    si = pl.program_id(2)

    @pl.when(si == 0)
    def _init():
        m_sc[...] = jnp.full(m_sc.shape, _NEG_INIT, dtype=jnp.float32)
        l_sc[...] = jnp.zeros(l_sc.shape, dtype=jnp.float32)
        acc_sc[...] = jnp.zeros(acc_sc.shape, dtype=jnp.float32)

    block_s = k_ref.shape[0]
    d_v = v_ref.shape[-1]
    bias = jnp.float32(masked_bias)

    # All H heads are processed per grid step, so K/V and the (head-broadcast) mask are
    # DMA'd once per (b, li, si) tile instead of once per head.
    for h in range(num_heads):
        q = q_ref[:, h, :] * scale            # (Lt, E): scale folded into the small operand
        k = k_ref[:, h, :]                    # (St, E)
        s = lax.dot_general(q, k, (((1,), (1,)), ((), ())),
                            preferred_element_type=jnp.float32)        # (Lt, St) f32

        if mask_flag:
            m = m_ref[h % m_ref.shape[0]]     # (Lt, St); shared across heads when mH == 1
            if m.dtype == jnp.bool_:
                s = jnp.where(m, s, bias)     # binary mask: single select
            else:
                # faithful to: scores*mask + where(mask==0, -log(1e10), 0)  (pre-scaled)
                mf = m.astype(jnp.float32)
                s = jnp.where(mf == 0.0, bias, s * mf)

        # Online (flash) softmax with lane-replicated running stats.
        m_prev = m_sc[h]                                                # (Lt, 128)
        l_prev = l_sc[h]
        m_next = jnp.maximum(m_prev, jnp.max(s, axis=-1, keepdims=True))
        alpha = jnp.exp(m_prev - m_next)                                # (Lt, 128)
        p = jnp.exp(s - _bcast_minor(m_next, block_s))                  # (Lt, St)
        l_sc[h] = alpha * l_prev + jnp.sum(p, axis=-1, keepdims=True)
        pv = lax.dot_general(p.astype(v_ref.dtype), v_ref[:, h, :],
                             (((1,), (0,)), ((), ())),
                             preferred_element_type=jnp.float32)        # (Lt, D) f32
        acc_sc[h] = _bcast_minor(alpha, d_v) * acc_sc[h] + pv
        m_sc[h] = m_next

    @pl.when(si == pl.num_programs(2) - 1)
    def _finalize():
        for h in range(num_heads):
            # Deferred normalization over the (Lt, D) accumulator; exact reciprocal.
            inv_l = pl.reciprocal(l_sc[h], approx=False)
            o_ref[:, h, :] = (acc_sc[h] * _bcast_minor(inv_l, d_v)).astype(o_ref.dtype)


def _pick_block(dim, target, align):
    """Largest tile <= target that divides dim and is `align`-aligned (or the full dim)."""
    if dim <= target:
        return dim
    b = (target // align) * align
    while b >= align:
        if dim % b == 0:
            return b
        b -= align
    return dim


def _auto_block_l(L, H, E, D, itemsize, mask_heads, mask_itemsize, sublane, block_s):
    """Pick the largest L tile whose padded per-step VMEM footprint stays comfortable."""
    def pad(x, m):
        return ((x + m - 1) // m) * m
    budget = 24 * 1024 * 1024
    choice = L
    for target in (512, 256, 128):
        bl = _pick_block(L, target, sublane)
        q_t = bl * pad(H, sublane) * pad(E, 128) * itemsize
        o_t = bl * pad(H, sublane) * pad(D, 128) * itemsize
        kv_t = block_s * pad(H, sublane) * (pad(E, 128) + pad(D, 128)) * itemsize
        m_t = mask_heads * bl * pad(block_s, 128) * mask_itemsize
        scr = (2 * _STAT_LANES + pad(D, 128)) * H * bl * 4
        est = 2 * (q_t + o_t + kv_t + m_t) + scr   # x2: double-buffered inputs/outputs
        choice = bl
        if est <= budget:
            break
    return choice


def full_attention(queries, keys, values, attn_mask=None, *, scale=None,
                   mask_flag=True, block_l=None, block_s=None):
    """Pallas equivalent of FullAttention.forward (eval mode, output_attention=False).

    queries: (B, L, H, E)   keys: (B, S, H, E)   values: (B, S, H, D)
    attn_mask: (B|1, H|1, L, S), only required when mask_flag=True (any dtype; bool/int8
               stream cheapest).
    returns: (V, None) with V of shape (B, L, H, D)
    """
    B, L, H, E = queries.shape
    _, S, _, D = values.shape
    scale = float(scale) if scale is not None else 1.0 / math.sqrt(E)
    masked_bias = scale * (-math.log(1e10))

    itemsize = jnp.dtype(queries.dtype).itemsize
    sublane = max(8, 32 // max(itemsize, 1))   # 8 for f32, 16 for bf16, 32 for int8

    mask_heads, mask_itemsize = 0, 0
    if mask_flag:
        assert attn_mask is not None and attn_mask.ndim == 4
        assert attn_mask.shape[2] == L and attn_mask.shape[3] == S
        mB, mH = attn_mask.shape[0], attn_mask.shape[1]
        assert mB in (1, B) and mH in (1, H), (mB, mH, B, H)
        mask_heads, mask_itemsize = mH, jnp.dtype(attn_mask.dtype).itemsize

    # Tile sizes: MXU/lane aligned, clamped to divisors of L/S, VMEM-aware L tile.
    block_s = min(block_s, S) if block_s is not None else _pick_block(S, 512, 128)
    if block_l is None:
        block_l = _auto_block_l(L, H, E, D, itemsize, mask_heads, mask_itemsize,
                                sublane, block_s)
    else:
        block_l = min(block_l, L)
    assert L % block_l == 0 and S % block_s == 0, (block_l, block_s, L, S)

    grid = (B, L // block_l, S // block_s)

    # Native-layout blocks: last two block dims are the full (H, E|D) extents, so no
    # (8,128) alignment issues and no transposes outside the kernel.
    in_specs = [
        pl.BlockSpec((None, block_l, H, E), lambda b, li, si: (b, li, 0, 0)),
        pl.BlockSpec((None, block_s, H, E), lambda b, li, si: (b, si, 0, 0)),
        pl.BlockSpec((None, block_s, H, D), lambda b, li, si: (b, si, 0, 0)),
    ]
    operands = [queries, keys, values]
    if mask_flag:
        mB = attn_mask.shape[0]

        def mask_index(b, li, si, _mB=mB):
            return (b if _mB != 1 else 0, 0, li, si)

        in_specs.append(pl.BlockSpec((None, mask_heads, block_l, block_s), mask_index))
        operands.append(attn_mask)

    kernel = functools.partial(
        _flash_attention_kernel, scale=scale, mask_flag=mask_flag,
        masked_bias=masked_bias, num_heads=H)

    vmem_limit = 48 * 1024 * 1024
    try:  # gate by actual device VMEM (v7x has 64 MiB per TC vs 128 MiB on v5e/v6e)
        vmem_limit = min(vmem_limit,
                         int(pltpu.get_tpu_info().vmem_capacity_bytes * 0.7))
    except Exception:
        pass

    out = pl.pallas_call(
        kernel,
        out_shape=jax.ShapeDtypeStruct((B, L, H, D), queries.dtype),
        grid_spec=pltpu.PrefetchScalarGridSpec(
            num_scalar_prefetch=0,
            grid=grid,
            in_specs=in_specs,
            out_specs=pl.BlockSpec((None, block_l, H, D),
                                   lambda b, li, si: (b, li, 0, 0)),
            scratch_shapes=[
                pltpu.VMEM((H, block_l, _STAT_LANES), jnp.float32),  # running max m_i
                pltpu.VMEM((H, block_l, _STAT_LANES), jnp.float32),  # running sum l_i
                pltpu.VMEM((H, block_l, D), jnp.float32),            # output accumulator
            ],
        ),
        compiler_params=pltpu.CompilerParams(
            dimension_semantics=("parallel", "parallel", "arbitrary"),
            vmem_limit_bytes=vmem_limit,
        ),
    )(*operands)

    return out, None


def _reference(queries, keys, values, attn_mask, *, scale=None, mask_flag=True):
    B, L, H, E = queries.shape
    scale = scale if scale is not None else 1.0 / math.sqrt(E)
    scores = jnp.einsum('blhe,bshe->bhls', queries, keys)
    if mask_flag:
        m = attn_mask.astype(scores.dtype)
        additive = jnp.where(m == 0, -math.log(1e10), 0.0)
        scores = scores * m + additive
    A = jax.nn.softmax(scale * scores, axis=-1)
    V = jnp.einsum('bhls,bshd->blhd', A, values)
    return V


if __name__ == "__main__":
    key = jax.random.PRNGKey(0)

    # --- Test 1: module-scale shapes, bool head-broadcast mask (narrow mask stream) ---
    B, L, S, H, E, D = 2, 8, 8, 4, 32, 32
    kq, kk, kv, km = jax.random.split(key, 4)
    queries = jax.random.normal(kq, (B, L, H, E), dtype=jnp.float32)
    keys = jax.random.normal(kk, (B, S, H, E), dtype=jnp.float32)
    values = jax.random.normal(kv, (B, S, H, D), dtype=jnp.float32)
    attn_mask = jax.random.uniform(km, (B, 1, L, S)) > 0.2        # bool mask (1=keep)

    V, A = full_attention(queries, keys, values, attn_mask, scale=None, mask_flag=True)
    V = jax.block_until_ready(V)
    V_ref = _reference(queries, keys, values, attn_mask, scale=None, mask_flag=True)
    assert V.shape == (B, L, H, D)
    assert A is None
    assert jnp.allclose(V, V_ref, atol=1e-4, rtol=1e-4), "test1 mismatch vs reference"

    # --- Test 2: mask_flag=False path (no mask operand, no mask DMA) ---
    V2, _ = full_attention(queries, keys, values, None, scale=None, mask_flag=False)
    V2 = jax.block_until_ready(V2)
    V2_ref = _reference(queries, keys, values, None, scale=None, mask_flag=False)
    assert jnp.allclose(V2, V2_ref, atol=1e-4, rtol=1e-4), "test2 mismatch vs reference"

    # --- Test 3: tiled online-softmax path (multi L/S tiles), per-head float mask ---
    B3, L3, S3, H3, E3, D3 = 1, 512, 512, 2, 32, 32
    k3 = jax.random.split(key, 8)
    q3 = jax.random.normal(k3[4], (B3, L3, H3, E3), dtype=jnp.float32)
    ke3 = jax.random.normal(k3[5], (B3, S3, H3, E3), dtype=jnp.float32)
    v3 = jax.random.normal(k3[6], (B3, S3, H3, D3), dtype=jnp.float32)
    m3 = (jax.random.uniform(k3[7], (B3, H3, L3, S3)) > 0.2).astype(jnp.float32)
    V3, _ = full_attention(q3, ke3, v3, m3, scale=None, mask_flag=True,
                           block_l=128, block_s=256)
    V3 = jax.block_until_ready(V3)
    V3_ref = _reference(q3, ke3, v3, m3, scale=None, mask_flag=True)
    assert jnp.allclose(V3, V3_ref, atol=1e-4, rtol=1e-4), "test3 mismatch vs reference"

    print("KERNEL_OK")
</pallas_src>

<mosaic_0001>
module attributes {stable_mosaic.version = 11 : i64} {
  func.func @_flash_attention_kernel(%arg0: i32, %arg1: i32, %arg2: i32, %arg3: memref<1x8x4x32xf32, #tpu.memory_space<vmem>>, %arg4: memref<1x8x4x32xf32, #tpu.memory_space<vmem>>, %arg5: memref<1x8x4x32xf32, #tpu.memory_space<vmem>>, %arg6: memref<1x1x8x8xi32, #tpu.memory_space<vmem>>, %arg7: memref<1x8x4x32xf32, #tpu.memory_space<vmem>>, %arg8: memref<4x8x128xf32, #tpu.memory_space<vmem>>, %arg9: memref<4x8x128xf32, #tpu.memory_space<vmem>>, %arg10: memref<4x8x32xf32, #tpu.memory_space<vmem>>) attributes {dimension_semantics = [#tpu.dimension_semantics<parallel>, #tpu.dimension_semantics<parallel>, #tpu.dimension_semantics<arbitrary>], iteration_bounds = array<i64: 2, 1, 1>, scalar_prefetch = 0 : i64, scratch_operands = 3 : i64, tpu.core_type = #tpu.core_type<tc>, window_params = [{transform_indices = @transform_0, window_bounds = array<i64: 1, 8, 4, 32>}, {transform_indices = @transform_1, window_bounds = array<i64: 1, 8, 4, 32>}, {transform_indices = @transform_2, window_bounds = array<i64: 1, 8, 4, 32>}, {transform_indices = @transform_3, window_bounds = array<i64: 1, 1, 8, 8>}, {transform_indices = @transform_4, window_bounds = array<i64: 1, 8, 4, 32>}]} {
    %c0_i32 = arith.constant 0 : i32
    %0 = arith.cmpi eq, %arg2, %c0_i32 : i32
    %1 = arith.extui %0 : i1 to i32
    %c0_i32_0 = arith.constant 0 : i32
    %2 = arith.cmpi ne, %1, %c0_i32_0 : i32
    scf.if %2 {
      %cst_162 = arith.constant -1.000000e+30 : f32
      %194 = vector.broadcast %cst_162 : f32 to vector<4x8x128xf32>
      %c0_163 = arith.constant 0 : index
      %c0_164 = arith.constant 0 : index
      %c0_165 = arith.constant 0 : index
      %195 = vector.load %arg8[%c0_163, %c0_164, %c0_165] : memref<4x8x128xf32, #tpu.memory_space<vmem>>, vector<4x8x128xf32>
      tpu.vector_store %arg8[%c0_163, %c0_164, %c0_165], %194 {strides = array<i32>} : memref<4x8x128xf32, #tpu.memory_space<vmem>>, vector<4x8x128xf32>,
      %cst_166 = arith.constant 0.000000e+00 : f32
      %196 = vector.broadcast %cst_166 : f32 to vector<4x8x128xf32>
      %c0_167 = arith.constant 0 : index
      %c0_168 = arith.constant 0 : index
      %c0_169 = arith.constant 0 : index
      %197 = vector.load %arg9[%c0_167, %c0_168, %c0_169] : memref<4x8x128xf32, #tpu.memory_space<vmem>>, vector<4x8x128xf32>
      tpu.vector_store %arg9[%c0_167, %c0_168, %c0_169], %196 {strides = array<i32>} : memref<4x8x128xf32, #tpu.memory_space<vmem>>, vector<4x8x128xf32>,
      %cst_170 = arith.constant 0.000000e+00 : f32
      %198 = vector.broadcast %cst_170 : f32 to vector<4x8x32xf32>
      %c0_171 = arith.constant 0 : index
      %c0_172 = arith.constant 0 : index
      %c0_173 = arith.constant 0 : index
      %199 = vector.load %arg10[%c0_171, %c0_172, %c0_173] : memref<4x8x32xf32, #tpu.memory_space<vmem>>, vector<4x8x32xf32>
      tpu.vector_store %arg10[%c0_171, %c0_172, %c0_173], %198 {strides = array<i32>} : memref<4x8x32xf32, #tpu.memory_space<vmem>>, vector<4x8x32xf32>,
    } else {
    }
    %c0 = arith.constant 0 : index
    %c0_1 = arith.constant 0 : index
    %c0_2 = arith.constant 0 : index
    %c0_3 = arith.constant 0 : index
    %3 = vector.load %arg3[%c0, %c0_1, %c0_2, %c0_3] : memref<1x8x4x32xf32, #tpu.memory_space<vmem>>, vector<1x8x1x32xf32>
    %4 = vector.shape_cast %3 : vector<1x8x1x32xf32> to vector<8x32xf32>
    %cst = arith.constant 0.176776692 : f32
    %5 = vector.broadcast %cst : f32 to vector<8x32xf32>
    %6 = arith.mulf %4, %5 : vector<8x32xf32>
    %c0_4 = arith.constant 0 : index
    %c0_5 = arith.constant 0 : index
    %c0_6 = arith.constant 0 : index
    %c0_7 = arith.constant 0 : index
    %7 = vector.load %arg4[%c0_4, %c0_5, %c0_6, %c0_7] : memref<1x8x4x32xf32, #tpu.memory_space<vmem>>, vector<1x8x1x32xf32>
    %8 = vector.shape_cast %7 : vector<1x8x1x32xf32> to vector<8x32xf32>
    %cst_8 = arith.constant dense<0.000000e+00> : vector<8x8xf32>
    %9 = tpu.matmul %6, %8, %cst_8 {dimension_numbers = #tpu.dot_dimension_numbers<[1], [1], [0], [0], [0, 0, 1, 0], [], []>} : vector<8x32xf32>, vector<8x32xf32>, vector<8x8xf32> -> vector<8x8xf32>
    %c0_9 = arith.constant 0 : index
    %c0_10 = arith.constant 0 : index
    %c0_11 = arith.constant 0 : index
    %c0_12 = arith.constant 0 : index
    %10 = vector.load %arg6[%c0_9, %c0_10, %c0_11, %c0_12] : memref<1x1x8x8xi32, #tpu.memory_space<vmem>>, vector<1x1x8x8xi32>
    %11 = vector.shape_cast %10 : vector<1x1x8x8xi32> to vector<8x8xi32>
    %cst_13 = arith.constant dense<0> : vector<8x8xi32>
    %12 = arith.cmpi ne, %11, %cst_13 : vector<8x8xi32>
    %cst_14 = arith.constant -4.07043362 : f32
    %13 = vector.broadcast %cst_14 : f32 to vector<8x8xf32>
    %14 = arith.select %12, %9, %13 : vector<8x8xi1>, vector<8x8xf32>
    %c0_15 = arith.constant 0 : index
    %c0_16 = arith.constant 0 : index
    %c0_17 = arith.constant 0 : index
    %15 = vector.load %arg8[%c0_15, %c0_16, %c0_17] : memref<4x8x128xf32, #tpu.memory_space<vmem>>, vector<1x8x128xf32>
    %16 = vector.shape_cast %15 : vector<1x8x128xf32> to vector<8x128xf32>
    %c0_18 = arith.constant 0 : index
    %c0_19 = arith.constant 0 : index
    %c0_20 = arith.constant 0 : index
    %17 = vector.load %arg9[%c0_18, %c0_19, %c0_20] : memref<4x8x128xf32, #tpu.memory_space<vmem>>, vector<1x8x128xf32>
    %18 = vector.shape_cast %17 : vector<1x8x128xf32> to vector<8x128xf32>
    %cst_21 = arith.constant dense<0xFF800000> : vector<8xf32>
    %19 = vector.multi_reduction <maximumf>, %14, %cst_21 [1] : vector<8x8xf32> to vector<8xf32>
    %20 = vector.shape_cast %19 : vector<8xf32> to vector<8x1xf32>
    %21 = vector.broadcast %20 : vector<8x1xf32> to vector<8x128xf32>
    %22 = arith.maximumf %16, %21 : vector<8x128xf32>
    %23 = arith.subf %16, %22 : vector<8x128xf32>
    %24 = math.exp %23 : vector<8x128xf32>
    %25 = vector.extract_strided_slice %22 {offsets = [0, 0], sizes = [8, 8], strides = [1, 1]} : vector<8x128xf32> to vector<8x8xf32>
    %26 = arith.subf %14, %25 : vector<8x8xf32>
    %27 = math.exp %26 : vector<8x8xf32>
    %28 = arith.mulf %24, %18 : vector<8x128xf32>
    %cst_22 = arith.constant dense<0.000000e+00> : vector<8xf32>
    %29 = vector.multi_reduction <add>, %27, %cst_22 [1] : vector<8x8xf32> to vector<8xf32>
    %30 = vector.shape_cast %29 : vector<8xf32> to vector<8x1xf32>
    %31 = vector.broadcast %30 : vector<8x1xf32> to vector<8x128xf32>
    %32 = arith.addf %28, %31 : vector<8x128xf32>
    %c0_23 = arith.constant 0 : index
    %c0_24 = arith.constant 0 : index
    %c0_25 = arith.constant 0 : index
    %33 = vector.load %arg9[%c0_23, %c0_24, %c0_25] : memref<4x8x128xf32, #tpu.memory_space<vmem>>, vector<1x8x128xf32>
    %34 = vector.shape_cast %33 : vector<1x8x128xf32> to vector<8x128xf32>
    %35 = vector.shape_cast %32 : vector<8x128xf32> to vector<1x8x128xf32>
    tpu.vector_store %arg9[%c0_23, %c0_24, %c0_25], %35 {strides = array<i32>} : memref<4x8x128xf32, #tpu.memory_space<vmem>>, vector<1x8x128xf32>,
    %c0_26 = arith.constant 0 : index
    %c0_27 = arith.constant 0 : index
    %c0_28 = arith.constant 0 : index
    %c0_29 = arith.constant 0 : index
    %36 = vector.load %arg5[%c0_26, %c0_27, %c0_28, %c0_29] : memref<1x8x4x32xf32, #tpu.memory_space<vmem>>, vector<1x8x1x32xf32>
    %37 = vector.shape_cast %36 : vector<1x8x1x32xf32> to vector<8x32xf32>
    %cst_30 = arith.constant dense<0.000000e+00> : vector<8x32xf32>
    %38 = tpu.matmul %27, %37, %cst_30 {dimension_numbers = #tpu.dot_dimension_numbers<[1], [0], [0], [1], [0, 0, 1, 1], [], []>} : vector<8x8xf32>, vector<8x32xf32>, vector<8x32xf32> -> vector<8x32xf32>
    %39 = vector.extract_strided_slice %24 {offsets = [0, 0], sizes = [8, 32], strides = [1, 1]} : vector<8x128xf32> to vector<8x32xf32>
    %c0_31 = arith.constant 0 : index
    %c0_32 = arith.constant 0 : index
    %c0_33 = arith.constant 0 : index
    %40 = vector.load %arg10[%c0_31, %c0_32, %c0_33] : memref<4x8x32xf32, #tpu.memory_space<vmem>>, vector<1x8x32xf32>
    %41 = vector.shape_cast %40 : vector<1x8x32xf32> to vector<8x32xf32>
    %42 = arith.mulf %39, %41 : vector<8x32xf32>
    %43 = arith.addf %42, %38 : vector<8x32xf32>
    %c0_34 = arith.constant 0 : index
    %c0_35 = arith.constant 0 : index
    %c0_36 = arith.constant 0 : index
    %44 = vector.load %arg10[%c0_34, %c0_35, %c0_36] : memref<4x8x32xf32, #tpu.memory_space<vmem>>, vector<1x8x32xf32>
    %45 = vector.shape_cast %44 : vector<1x8x32xf32> to vector<8x32xf32>
    %46 = vector.shape_cast %43 : vector<8x32xf32> to vector<1x8x32xf32>
    tpu.vector_store %arg10[%c0_34, %c0_35, %c0_36], %46 {strides = array<i32>} : memref<4x8x32xf32, #tpu.memory_space<vmem>>, vector<1x8x32xf32>,
    %c0_37 = arith.constant 0 : index
    %c0_38 = arith.constant 0 : index
    %c0_39 = arith.constant 0 : index
    %47 = vector.load %arg8[%c0_37, %c0_38, %c0_39] : memref<4x8x128xf32, #tpu.memory_space<vmem>>, vector<1x8x128xf32>
    %48 = vector.shape_cast %47 : vector<1x8x128xf32> to vector<8x128xf32>
    %49 = vector.shape_cast %22 : vector<8x128xf32> to vector<1x8x128xf32>
    tpu.vector_store %arg8[%c0_37, %c0_38, %c0_39], %49 {strides = array<i32>} : memref<4x8x128xf32, #tpu.memory_space<vmem>>, vector<1x8x128xf32>,
    %c0_40 = arith.constant 0 : index
    %c0_41 = arith.constant 0 : index
    %c1 = arith.constant 1 : index
    %c0_42 = arith.constant 0 : index
    %50 = vector.load %arg3[%c0_40, %c0_41, %c1, %c0_42] : memref<1x8x4x32xf32, #tpu.memory_space<vmem>>, vector<1x8x1x32xf32>
    %51 = vector.shape_cast %50 : vector<1x8x1x32xf32> to vector<8x32xf32>
    %cst_43 = arith.constant 0.176776692 : f32
    %52 = vector.broadcast %cst_43 : f32 to vector<8x32xf32>
    %53 = arith.mulf %51, %52 : vector<8x32xf32>
    %c0_44 = arith.constant 0 : index
    %c0_45 = arith.constant 0 : index
    %c1_46 = arith.constant 1 : index
    %c0_47 = arith.constant 0 : index
    %54 = vector.load %arg4[%c0_44, %c0_45, %c1_46, %c0_47] : memref<1x8x4x32xf32, #tpu.memory_space<vmem>>, vector<1x8x1x32xf32>
    %55 = vector.shape_cast %54 : vector<1x8x1x32xf32> to vector<8x32xf32>
    %cst_48 = arith.constant dense<0.000000e+00> : vector<8x8xf32>
    %56 = tpu.matmul %53, %55, %cst_48 {dimension_numbers = #tpu.dot_dimension_numbers<[1], [1], [0], [0], [0, 0, 1, 0], [], []>} : vector<8x32xf32>, vector<8x32xf32>, vector<8x8xf32> -> vector<8x8xf32>
    %c0_49 = arith.constant 0 : index
    %c0_50 = arith.constant 0 : index
    %c0_51 = arith.constant 0 : index
    %c0_52 = arith.constant 0 : index
    %57 = vector.load %arg6[%c0_49, %c0_50, %c0_51, %c0_52] : memref<1x1x8x8xi32, #tpu.memory_space<vmem>>, vector<1x1x8x8xi32>
    %58 = vector.shape_cast %57 : vector<1x1x8x8xi32> to vector<8x8xi32>
    %cst_53 = arith.constant dense<0> : vector<8x8xi32>
    %59 = arith.cmpi ne, %58, %cst_53 : vector<8x8xi32>
    %cst_54 = arith.constant -4.07043362 : f32
    %60 = vector.broadcast %cst_54 : f32 to vector<8x8xf32>
    %61 = arith.select %59, %56, %60 : vector<8x8xi1>, vector<8x8xf32>
    %c1_55 = arith.constant 1 : index
    %c0_56 = arith.constant 0 : index
    %c0_57 = arith.constant 0 : index
    %62 = vector.load %arg8[%c1_55, %c0_56, %c0_57] : memref<4x8x128xf32, #tpu.memory_space<vmem>>, vector<1x8x128xf32>
    %63 = vector.shape_cast %62 : vector<1x8x128xf32> to vector<8x128xf32>
    %c1_58 = arith.constant 1 : index
    %c0_59 = arith.constant 0 : index
    %c0_60 = arith.constant 0 : index
    %64 = vector.load %arg9[%c1_58, %c0_59, %c0_60] : memref<4x8x128xf32, #tpu.memory_space<vmem>>, vector<1x8x128xf32>
    %65 = vector.shape_cast %64 : vector<1x8x128xf32> to vector<8x128xf32>
    %cst_61 = arith.constant dense<0xFF800000> : vector<8xf32>
    %66 = vector.multi_reduction <maximumf>, %61, %cst_61 [1] : vector<8x8xf32> to vector<8xf32>
    %67 = vector.shape_cast %66 : vector<8xf32> to vector<8x1xf32>
    %68 = vector.broadcast %67 : vector<8x1xf32> to vector<8x128xf32>
    %69 = arith.maximumf %63, %68 : vector<8x128xf32>
    %70 = arith.subf %63, %69 : vector<8x128xf32>
    %71 = math.exp %70 : vector<8x128xf32>
    %72 = vector.extract_strided_slice %69 {offsets = [0, 0], sizes = [8, 8], strides = [1, 1]} : vector<8x128xf32> to vector<8x8xf32>
    %73 = arith.subf %61, %72 : vector<8x8xf32>
    %74 = math.exp %73 : vector<8x8xf32>
    %75 = arith.mulf %71, %65 : vector<8x128xf32>
    %cst_62 = arith.constant dense<0.000000e+00> : vector<8xf32>
    %76 = vector.multi_reduction <add>, %74, %cst_62 [1] : vector<8x8xf32> to vector<8xf32>
    %77 = vector.shape_cast %76 : vector<8xf32> to vector<8x1xf32>
    %78 = vector.broadcast %77 : vector<8x1xf32> to vector<8x128xf32>
    %79 = arith.addf %75, %78 : vector<8x128xf32>
    %c1_63 = arith.constant 1 : index
    %c0_64 = arith.constant 0 : index
    %c0_65 = arith.constant 0 : index
    %80 = vector.load %arg9[%c1_63, %c0_64, %c0_65] : memref<4x8x128xf32, #tpu.memory_space<vmem>>, vector<1x8x128xf32>
    %81 = vector.shape_cast %80 : vector<1x8x128xf32> to vector<8x128xf32>
    %82 = vector.shape_cast %79 : vector<8x128xf32> to vector<1x8x128xf32>
    tpu.vector_store %arg9[%c1_63, %c0_64, %c0_65], %82 {strides = array<i32>} : memref<4x8x128xf32, #tpu.memory_space<vmem>>, vector<1x8x128xf32>,
    %c0_66 = arith.constant 0 : index
    %c0_67 = arith.constant 0 : index
    %c1_68 = arith.constant 1 : index
    %c0_69 = arith.constant 0 : index
    %83 = vector.load %arg5[%c0_66, %c0_67, %c1_68, %c0_69] : memref<1x8x4x32xf32, #tpu.memory_space<vmem>>, vector<1x8x1x32xf32>
    %84 = vector.shape_cast %83 : vector<1x8x1x32xf32> to vector<8x32xf32>
    %cst_70 = arith.constant dense<0.000000e+00> : vector<8x32xf32>
    %85 = tpu.matmul %74, %84, %cst_70 {dimension_numbers = #tpu.dot_dimension_numbers<[1], [0], [0], [1], [0, 0, 1, 1], [], []>} : vector<8x8xf32>, vector<8x32xf32>, vector<8x32xf32> -> vector<8x32xf32>
    %86 = vector.extract_strided_slice %71 {offsets = [0, 0], sizes = [8, 32], strides = [1, 1]} : vector<8x128xf32> to vector<8x32xf32>
    %c1_71 = arith.constant 1 : index
    %c0_72 = arith.constant 0 : index
    %c0_73 = arith.constant 0 : index
    %87 = vector.load %arg10[%c1_71, %c0_72, %c0_73] : memref<4x8x32xf32, #tpu.memory_space<vmem>>, vector<1x8x32xf32>
    %88 = vector.shape_cast %87 : vector<1x8x32xf32> to vector<8x32xf32>
    %89 = arith.mulf %86, %88 : vector<8x32xf32>
    %90 = arith.addf %89, %85 : vector<8x32xf32>
    %c1_74 = arith.constant 1 : index
    %c0_75 = arith.constant 0 : index
    %c0_76 = arith.constant 0 : index
    %91 = vector.load %arg10[%c1_74, %c0_75, %c0_76] : memref<4x8x32xf32, #tpu.memory_space<vmem>>, vector<1x8x32xf32>
    %92 = vector.shape_cast %91 : vector<1x8x32xf32> to vector<8x32xf32>
    %93 = vector.shape_cast %90 : vector<8x32xf32> to vector<1x8x32xf32>
    tpu.vector_store %arg10[%c1_74, %c0_75, %c0_76], %93 {strides = array<i32>} : memref<4x8x32xf32, #tpu.memory_space<vmem>>, vector<1x8x32xf32>,
    %c1_77 = arith.constant 1 : index
    %c0_78 = arith.constant 0 : index
    %c0_79 = arith.constant 0 : index
    %94 = vector.load %arg8[%c1_77, %c0_78, %c0_79] : memref<4x8x128xf32, #tpu.memory_space<vmem>>, vector<1x8x128xf32>
    %95 = vector.shape_cast %94 : vector<1x8x128xf32> to vector<8x128xf32>
    %96 = vector.shape_cast %69 : vector<8x128xf32> to vector<1x8x128xf32>
    tpu.vector_store %arg8[%c1_77, %c0_78, %c0_79], %96 {strides = array<i32>} : memref<4x8x128xf32, #tpu.memory_space<vmem>>, vector<1x8x128xf32>,
    %c0_80 = arith.constant 0 : index
    %c0_81 = arith.constant 0 : index
    %c2 = arith.constant 2 : index
    %c0_82 = arith.constant 0 : index
    %97 = vector.load %arg3[%c0_80, %c0_81, %c2, %c0_82] : memref<1x8x4x32xf32, #tpu.memory_space<vmem>>, vector<1x8x1x32xf32>
    %98 = vector.shape_cast %97 : vector<1x8x1x32xf32> to vector<8x32xf32>
    %cst_83 = arith.constant 0.176776692 : f32
    %99 = vector.broadcast %cst_83 : f32 to vector<8x32xf32>
    %100 = arith.mulf %98, %99 : vector<8x32xf32>
    %c0_84 = arith.constant 0 : index
    %c0_85 = arith.constant 0 : index
    %c2_86 = arith.constant 2 : index
    %c0_87 = arith.constant 0 : index
    %101 = vector.load %arg4[%c0_84, %c0_85, %c2_86, %c0_87] : memref<1x8x4x32xf32, #tpu.memory_space<vmem>>, vector<1x8x1x32xf32>
    %102 = vector.shape_cast %101 : vector<1x8x1x32xf32> to vector<8x32xf32>
    %cst_88 = arith.constant dense<0.000000e+00> : vector<8x8xf32>
    %103 = tpu.matmul %100, %102, %cst_88 {dimension_numbers = #tpu.dot_dimension_numbers<[1], [1], [0], [0], [0, 0, 1, 0], [], []>} : vector<8x32xf32>, vector<8x32xf32>, vector<8x8xf32> -> vector<8x8xf32>
    %c0_89 = arith.constant 0 : index
    %c0_90 = arith.constant 0 : index
    %c0_91 = arith.constant 0 : index
    %c0_92 = arith.constant 0 : index
    %104 = vector.load %arg6[%c0_89, %c0_90, %c0_91, %c0_92] : memref<1x1x8x8xi32, #tpu.memory_space<vmem>>, vector<1x1x8x8xi32>
    %105 = vector.shape_cast %104 : vector<1x1x8x8xi32> to vector<8x8xi32>
    %cst_93 = arith.constant dense<0> : vector<8x8xi32>
    %106 = arith.cmpi ne, %105, %cst_93 : vector<8x8xi32>
    %cst_94 = arith.constant -4.07043362 : f32
    %107 = vector.broadcast %cst_94 : f32 to vector<8x8xf32>
    %108 = arith.select %106, %103, %107 : vector<8x8xi1>, vector<8x8xf32>
    %c2_95 = arith.constant 2 : index
    %c0_96 = arith.constant 0 : index
    %c0_97 = arith.constant 0 : index
    %109 = vector.load %arg8[%c2_95, %c0_96, %c0_97] : memref<4x8x128xf32, #tpu.memory_space<vmem>>, vector<1x8x128xf32>
    %110 = vector.shape_cast %109 : vector<1x8x128xf32> to vector<8x128xf32>
    %c2_98 = arith.constant 2 : index
    %c0_99 = arith.constant 0 : index
    %c0_100 = arith.constant 0 : index
    %111 = vector.load %arg9[%c2_98, %c0_99, %c0_100] : memref<4x8x128xf32, #tpu.memory_space<vmem>>, vector<1x8x128xf32>
    %112 = vector.shape_cast %111 : vector<1x8x128xf32> to vector<8x128xf32>
    %cst_101 = arith.constant dense<0xFF800000> : vector<8xf32>
    %113 = vector.multi_reduction <maximumf>, %108, %cst_101 [1] : vector<8x8xf32> to vector<8xf32>
    %114 = vector.shape_cast %113 : vector<8xf32> to vector<8x1xf32>
    %115 = vector.broadcast %114 : vector<8x1xf32> to vector<8x128xf32>
    %116 = arith.maximumf %110, %115 : vector<8x128xf32>
    %117 = arith.subf %110, %116 : vector<8x128xf32>
    %118 = math.exp %117 : vector<8x128xf32>
    %119 = vector.extract_strided_slice %116 {offsets = [0, 0], sizes = [8, 8], strides = [1, 1]} : vector<8x128xf32> to vector<8x8xf32>
    %120 = arith.subf %108, %119 : vector<8x8xf32>
    %121 = math.exp %120 : vector<8x8xf32>
    %122 = arith.mulf %118, %112 : vector<8x128xf32>
    %cst_102 = arith.constant dense<0.000000e+00> : vector<8xf32>
    %123 = vector.multi_reduction <add>, %121, %cst_102 [1] : vector<8x8xf32> to vector<8xf32>
    %124 = vector.shape_cast %123 : vector<8xf32> to vector<8x1xf32>
    %125 = vector.broadcast %124 : vector<8x1xf32> to vector<8x128xf32>
    %126 = arith.addf %122, %125 : vector<8x128xf32>
    %c2_103 = arith.constant 2 : index
    %c0_104 = arith.constant 0 : index
    %c0_105 = arith.constant 0 : index
    %127 = vector.load %arg9[%c2_103, %c0_104, %c0_105] : memref<4x8x128xf32, #tpu.memory_space<vmem>>, vector<1x8x128xf32>
    %128 = vector.shape_cast %127 : vector<1x8x128xf32> to vector<8x128xf32>
    %129 = vector.shape_cast %126 : vector<8x128xf32> to vector<1x8x128xf32>
    tpu.vector_store %arg9[%c2_103, %c0_104, %c0_105], %129 {strides = array<i32>} : memref<4x8x128xf32, #tpu.memory_space<vmem>>, vector<1x8x128xf32>,
    %c0_106 = arith.constant 0 : index
    %c0_107 = arith.constant 0 : index
    %c2_108 = arith.constant 2 : index
    %c0_109 = arith.constant 0 : index
    %130 = vector.load %arg5[%c0_106, %c0_107, %c2_108, %c0_109] : memref<1x8x4x32xf32, #tpu.memory_space<vmem>>, vector<1x8x1x32xf32>
    %131 = vector.shape_cast %130 : vector<1x8x1x32xf32> to vector<8x32xf32>
    %cst_110 = arith.constant dense<0.000000e+00> : vector<8x32xf32>
    %132 = tpu.matmul %121, %131, %cst_110 {dimension_numbers = #tpu.dot_dimension_numbers<[1], [0], [0], [1], [0, 0, 1, 1], [], []>} : vector<8x8xf32>, vector<8x32xf32>, vector<8x32xf32> -> vector<8x32xf32>
    %133 = vector.extract_strided_slice %118 {offsets = [0, 0], sizes = [8, 32], strides = [1, 1]} : vector<8x128xf32> to vector<8x32xf32>
    %c2_111 = arith.constant 2 : index
    %c0_112 = arith.constant 0 : index
    %c0_113 = arith.constant 0 : index
    %134 = vector.load %arg10[%c2_111, %c0_112, %c0_113] : memref<4x8x32xf32, #tpu.memory_space<vmem>>, vector<1x8x32xf32>
    %135 = vector.shape_cast %134 : vector<1x8x32xf32> to vector<8x32xf32>
    %136 = arith.mulf %133, %135 : vector<8x32xf32>
    %137 = arith.addf %136, %132 : vector<8x32xf32>
    %c2_114 = arith.constant 2 : index
    %c0_115 = arith.constant 0 : index
    %c0_116 = arith.constant 0 : index
    %138 = vector.load %arg10[%c2_114, %c0_115, %c0_116] : memref<4x8x32xf32, #tpu.memory_space<vmem>>, vector<1x8x32xf32>
    %139 = vector.shape_cast %138 : vector<1x8x32xf32> to vector<8x32xf32>
    %140 = vector.shape_cast %137 : vector<8x32xf32> to vector<1x8x32xf32>
    tpu.vector_store %arg10[%c2_114, %c0_115, %c0_116], %140 {strides = array<i32>} : memref<4x8x32xf32, #tpu.memory_space<vmem>>, vector<1x8x32xf32>,
    %c2_117 = arith.constant 2 : index
    %c0_118 = arith.constant 0 : index
    %c0_119 = arith.constant 0 : index
    %141 = vector.load %arg8[%c2_117, %c0_118, %c0_119] : memref<4x8x128xf32, #tpu.memory_space<vmem>>, vector<1x8x128xf32>
    %142 = vector.shape_cast %141 : vector<1x8x128xf32> to vector<8x128xf32>
    %143 = vector.shape_cast %116 : vector<8x128xf32> to vector<1x8x128xf32>
    tpu.vector_store %arg8[%c2_117, %c0_118, %c0_119], %143 {strides = array<i32>} : memref<4x8x128xf32, #tpu.memory_space<vmem>>, vector<1x8x128xf32>,
    %c0_120 = arith.constant 0 : index
    %c0_121 = arith.constant 0 : index
    %c3 = arith.constant 3 : index
    %c0_122 = arith.constant 0 : index
    %144 = vector.load %arg3[%c0_120, %c0_121, %c3, %c0_122] : memref<1x8x4x32xf32, #tpu.memory_space<vmem>>, vector<1x8x1x32xf32>
    %145 = vector.shape_cast %144 : vector<1x8x1x32xf32> to vector<8x32xf32>
    %cst_123 = arith.constant 0.176776692 : f32
    %146 = vector.broadcast %cst_123 : f32 to vector<8x32xf32>
    %147 = arith.mulf %145, %146 : vector<8x32xf32>
    %c0_124 = arith.constant 0 : index
    %c0_125 = arith.constant 0 : index
    %c3_126 = arith.constant 3 : index
    %c0_127 = arith.constant 0 : index
    %148 = vector.load %arg4[%c0_124, %c0_125, %c3_126, %c0_127] : memref<1x8x4x32xf32, #tpu.memory_space<vmem>>, vector<1x8x1x32xf32>
    %149 = vector.shape_cast %148 : vector<1x8x1x32xf32> to vector<8x32xf32>
    %cst_128 = arith.constant dense<0.000000e+00> : vector<8x8xf32>
    %150 = tpu.matmul %147, %149, %cst_128 {dimension_numbers = #tpu.dot_dimension_numbers<[1], [1], [0], [0], [0, 0, 1, 0], [], []>} : vector<8x32xf32>, vector<8x32xf32>, vector<8x8xf32> -> vector<8x8xf32>
    %c0_129 = arith.constant 0 : index
    %c0_130 = arith.constant 0 : index
    %c0_131 = arith.constant 0 : index
    %c0_132 = arith.constant 0 : index
    %151 = vector.load %arg6[%c0_129, %c0_130, %c0_131, %c0_132] : memref<1x1x8x8xi32, #tpu.memory_space<vmem>>, vector<1x1x8x8xi32>
    %152 = vector.shape_cast %151 : vector<1x1x8x8xi32> to vector<8x8xi32>
    %cst_133 = arith.constant dense<0> : vector<8x8xi32>
    %153 = arith.cmpi ne, %152, %cst_133 : vector<8x8xi32>
    %cst_134 = arith.constant -4.07043362 : f32
    %154 = vector.broadcast %cst_134 : f32 to vector<8x8xf32>
    %155 = arith.select %153, %150, %154 : vector<8x8xi1>, vector<8x8xf32>
    %c3_135 = arith.constant 3 : index
    %c0_136 = arith.constant 0 : index
    %c0_137 = arith.constant 0 : index
    %156 = vector.load %arg8[%c3_135, %c0_136, %c0_137] : memref<4x8x128xf32, #tpu.memory_space<vmem>>, vector<1x8x128xf32>
    %157 = vector.shape_cast %156 : vector<1x8x128xf32> to vector<8x128xf32>
    %c3_138 = arith.constant 3 : index
    %c0_139 = arith.constant 0 : index
    %c0_140 = arith.constant 0 : index
    %158 = vector.load %arg9[%c3_138, %c0_139, %c0_140] : memref<4x8x128xf32, #tpu.memory_space<vmem>>, vector<1x8x128xf32>
    %159 = vector.shape_cast %158 : vector<1x8x128xf32> to vector<8x128xf32>
    %cst_141 = arith.constant dense<0xFF800000> : vector<8xf32>
    %160 = vector.multi_reduction <maximumf>, %155, %cst_141 [1] : vector<8x8xf32> to vector<8xf32>
    %161 = vector.shape_cast %160 : vector<8xf32> to vector<8x1xf32>
    %162 = vector.broadcast %161 : vector<8x1xf32> to vector<8x128xf32>
    %163 = arith.maximumf %157, %162 : vector<8x128xf32>
    %164 = arith.subf %157, %163 : vector<8x128xf32>
    %165 = math.exp %164 : vector<8x128xf32>
    %166 = vector.extract_strided_slice %163 {offsets = [0, 0], sizes = [8, 8], strides = [1, 1]} : vector<8x128xf32> to vector<8x8xf32>
    %167 = arith.subf %155, %166 : vector<8x8xf32>
    %168 = math.exp %167 : vector<8x8xf32>
    %169 = arith.mulf %165, %159 : vector<8x128xf32>
    %cst_142 = arith.constant dense<0.000000e+00> : vector<8xf32>
    %170 = vector.multi_reduction <add>, %168, %cst_142 [1] : vector<8x8xf32> to vector<8xf32>
    %171 = vector.shape_cast %170 : vector<8xf32> to vector<8x1xf32>
    %172 = vector.broadcast %171 : vector<8x1xf32> to vector<8x128xf32>
    %173 = arith.addf %169, %172 : vector<8x128xf32>
    %c3_143 = arith.constant 3 : index
    %c0_144 = arith.constant 0 : index
    %c0_145 = arith.constant 0 : index
    %174 = vector.load %arg9[%c3_143, %c0_144, %c0_145] : memref<4x8x128xf32, #tpu.memory_space<vmem>>, vector<1x8x128xf32>
    %175 = vector.shape_cast %174 : vector<1x8x128xf32> to vector<8x128xf32>
    %176 = vector.shape_cast %173 : vector<8x128xf32> to vector<1x8x128xf32>
    tpu.vector_store %arg9[%c3_143, %c0_144, %c0_145], %176 {strides = array<i32>} : memref<4x8x128xf32, #tpu.memory_space<vmem>>, vector<1x8x128xf32>,
    %c0_146 = arith.constant 0 : index
    %c0_147 = arith.constant 0 : index
    %c3_148 = arith.constant 3 : index
    %c0_149 = arith.constant 0 : index
    %177 = vector.load %arg5[%c0_146, %c0_147, %c3_148, %c0_149] : memref<1x8x4x32xf32, #tpu.memory_space<vmem>>, vector<1x8x1x32xf32>
    %178 = vector.shape_cast %177 : vector<1x8x1x32xf32> to vector<8x32xf32>
    %cst_150 = arith.constant dense<0.000000e+00> : vector<8x32xf32>
    %179 = tpu.matmul %168, %178, %cst_150 {dimension_numbers = #tpu.dot_dimension_numbers<[1], [0], [0], [1], [0, 0, 1, 1], [], []>} : vector<8x8xf32>, vector<8x32xf32>, vector<8x32xf32> -> vector<8x32xf32>
    %180 = vector.extract_strided_slice %165 {offsets = [0, 0], sizes = [8, 32], strides = [1, 1]} : vector<8x128xf32> to vector<8x32xf32>
    %c3_151 = arith.constant 3 : index
    %c0_152 = arith.constant 0 : index
    %c0_153 = arith.constant 0 : index
    %181 = vector.load %arg10[%c3_151, %c0_152, %c0_153] : memref<4x8x32xf32, #tpu.memory_space<vmem>>, vector<1x8x32xf32>
    %182 = vector.shape_cast %181 : vector<1x8x32xf32> to vector<8x32xf32>
    %183 = arith.mulf %180, %182 : vector<8x32xf32>
    %184 = arith.addf %183, %179 : vector<8x32xf32>
    %c3_154 = arith.constant 3 : index
    %c0_155 = arith.constant 0 : index
    %c0_156 = arith.constant 0 : index
    %185 = vector.load %arg10[%c3_154, %c0_155, %c0_156] : memref<4x8x32xf32, #tpu.memory_space<vmem>>, vector<1x8x32xf32>
    %186 = vector.shape_cast %185 : vector<1x8x32xf32> to vector<8x32xf32>
    %187 = vector.shape_cast %184 : vector<8x32xf32> to vector<1x8x32xf32>
    tpu.vector_store %arg10[%c3_154, %c0_155, %c0_156], %187 {strides = array<i32>} : memref<4x8x32xf32, #tpu.memory_space<vmem>>, vector<1x8x32xf32>,
    %c3_157 = arith.constant 3 : index
    %c0_158 = arith.constant 0 : index
    %c0_159 = arith.constant 0 : index
    %188 = vector.load %arg8[%c3_157, %c0_158, %c0_159] : memref<4x8x128xf32, #tpu.memory_space<vmem>>, vector<1x8x128xf32>
    %189 = vector.shape_cast %188 : vector<1x8x128xf32> to vector<8x128xf32>
    %190 = vector.shape_cast %163 : vector<8x128xf32> to vector<1x8x128xf32>
    tpu.vector_store %arg8[%c3_157, %c0_158, %c0_159], %190 {strides = array<i32>} : memref<4x8x128xf32, #tpu.memory_space<vmem>>, vector<1x8x128xf32>,
    %c0_i32_160 = arith.constant 0 : i32
    %191 = arith.cmpi eq, %arg2, %c0_i32_160 : i32
    %192 = arith.extui %191 : i1 to i32
    %c0_i32_161 = arith.constant 0 : i32
    %193 = arith.cmpi ne, %192, %c0_i32_161 : i32
    scf.if %193 {
      %c0_162 = arith.constant 0 : index
      %c0_163 = arith.constant 0 : index
      %c0_164 = arith.constant 0 : index
      %194 = vector.load %arg9[%c0_162, %c0_163, %c0_164] : memref<4x8x128xf32, #tpu.memory_space<vmem>>, vector<1x8x128xf32>
      %195 = vector.shape_cast %194 : vector<1x8x128xf32> to vector<8x128xf32>
      %196 = tpu.reciprocal %195 : vector<8x128xf32> -> vector<8x128xf32>
      %c0_165 = arith.constant 0 : index
      %c0_166 = arith.constant 0 : index
      %c0_167 = arith.constant 0 : index
      %197 = vector.load %arg10[%c0_165, %c0_166, %c0_167] : memref<4x8x32xf32, #tpu.memory_space<vmem>>, vector<1x8x32xf32>
      %198 = vector.shape_cast %197 : vector<1x8x32xf32> to vector<8x32xf32>
      %199 = vector.extract_strided_slice %196 {offsets = [0, 0], sizes = [8, 32], strides = [1, 1]} : vector<8x128xf32> to vector<8x32xf32>
      %200 = arith.mulf %198, %199 : vector<8x32xf32>
      %c0_168 = arith.constant 0 : index
      %c0_169 = arith.constant 0 : index
      %c0_170 = arith.constant 0 : index
      %c0_171 = arith.constant 0 : index
      %201 = vector.load %arg7[%c0_168, %c0_169, %c0_170, %c0_171] : memref<1x8x4x32xf32, #tpu.memory_space<vmem>>, vector<1x8x1x32xf32>
      %202 = vector.shape_cast %201 : vector<1x8x1x32xf32> to vector<8x32xf32>
      %203 = vector.shape_cast %200 : vector<8x32xf32> to vector<1x8x1x32xf32>
      tpu.vector_store %arg7[%c0_168, %c0_169, %c0_170, %c0_171], %203 {strides = array<i32>} : memref<1x8x4x32xf32, #tpu.memory_space<vmem>>, vector<1x8x1x32xf32>,
      %c1_172 = arith.constant 1 : index
      %c0_173 = arith.constant 0 : index
      %c0_174 = arith.constant 0 : index
      %204 = vector.load %arg9[%c1_172, %c0_173, %c0_174] : memref<4x8x128xf32, #tpu.memory_space<vmem>>, vector<1x8x128xf32>
      %205 = vector.shape_cast %204 : vector<1x8x128xf32> to vector<8x128xf32>
      %206 = tpu.reciprocal %205 : vector<8x128xf32> -> vector<8x128xf32>
      %c1_175 = arith.constant 1 : index
      %c0_176 = arith.constant 0 : index
      %c0_177 = arith.constant 0 : index
      %207 = vector.load %arg10[%c1_175, %c0_176, %c0_177] : memref<4x8x32xf32, #tpu.memory_space<vmem>>, vector<1x8x32xf32>
      %208 = vector.shape_cast %207 : vector<1x8x32xf32> to vector<8x32xf32>
      %209 = vector.extract_strided_slice %206 {offsets = [0, 0], sizes = [8, 32], strides = [1, 1]} : vector<8x128xf32> to vector<8x32xf32>
      %210 = arith.mulf %208, %209 : vector<8x32xf32>
      %c0_178 = arith.constant 0 : index
      %c0_179 = arith.constant 0 : index
      %c1_180 = arith.constant 1 : index
      %c0_181 = arith.constant 0 : index
      %211 = vector.load %arg7[%c0_178, %c0_179, %c1_180, %c0_181] : memref<1x8x4x32xf32, #tpu.memory_space<vmem>>, vector<1x8x1x32xf32>
      %212 = vector.shape_cast %211 : vector<1x8x1x32xf32> to vector<8x32xf32>
      %213 = vector.shape_cast %210 : vector<8x32xf32> to vector<1x8x1x32xf32>
      tpu.vector_store %arg7[%c0_178, %c0_179, %c1_180, %c0_181], %213 {strides = array<i32>} : memref<1x8x4x32xf32, #tpu.memory_space<vmem>>, vector<1x8x1x32xf32>,
      %c2_182 = arith.constant 2 : index
      %c0_183 = arith.constant 0 : index
      %c0_184 = arith.constant 0 : index
      %214 = vector.load %arg9[%c2_182, %c0_183, %c0_184] : memref<4x8x128xf32, #tpu.memory_space<vmem>>, vector<1x8x128xf32>
      %215 = vector.shape_cast %214 : vector<1x8x128xf32> to vector<8x128xf32>
      %216 = tpu.reciprocal %215 : vector<8x128xf32> -> vector<8x128xf32>
      %c2_185 = arith.constant 2 : index
      %c0_186 = arith.constant 0 : index
      %c0_187 = arith.constant 0 : index
      %217 = vector.load %arg10[%c2_185, %c0_186, %c0_187] : memref<4x8x32xf32, #tpu.memory_space<vmem>>, vector<1x8x32xf32>
      %218 = vector.shape_cast %217 : vector<1x8x32xf32> to vector<8x32xf32>
      %219 = vector.extract_strided_slice %216 {offsets = [0, 0], sizes = [8, 32], strides = [1, 1]} : vector<8x128xf32> to vector<8x32xf32>
      %220 = arith.mulf %218, %219 : vector<8x32xf32>
      %c0_188 = arith.constant 0 : index
      %c0_189 = arith.constant 0 : index
      %c2_190 = arith.constant 2 : index
      %c0_191 = arith.constant 0 : index
      %221 = vector.load %arg7[%c0_188, %c0_189, %c2_190, %c0_191] : memref<1x8x4x32xf32, #tpu.memory_space<vmem>>, vector<1x8x1x32xf32>
      %222 = vector.shape_cast %221 : vector<1x8x1x32xf32> to vector<8x32xf32>
      %223 = vector.shape_cast %220 : vector<8x32xf32> to vector<1x8x1x32xf32>
      tpu.vector_store %arg7[%c0_188, %c0_189, %c2_190, %c0_191], %223 {strides = array<i32>} : memref<1x8x4x32xf32, #tpu.memory_space<vmem>>, vector<1x8x1x32xf32>,
      %c3_192 = arith.constant 3 : index
      %c0_193 = arith.constant 0 : index
      %c0_194 = arith.constant 0 : index
      %224 = vector.load %arg9[%c3_192, %c0_193, %c0_194] : memref<4x8x128xf32, #tpu.memory_space<vmem>>, vector<1x8x128xf32>
      %225 = vector.shape_cast %224 : vector<1x8x128xf32> to vector<8x128xf32>
      %226 = tpu.reciprocal %225 : vector<8x128xf32> -> vector<8x128xf32>
      %c3_195 = arith.constant 3 : index
      %c0_196 = arith.constant 0 : index
      %c0_197 = arith.constant 0 : index
      %227 = vector.load %arg10[%c3_195, %c0_196, %c0_197] : memref<4x8x32xf32, #tpu.memory_space<vmem>>, vector<1x8x32xf32>
      %228 = vector.shape_cast %227 : vector<1x8x32xf32> to vector<8x32xf32>
      %229 = vector.extract_strided_slice %226 {offsets = [0, 0], sizes = [8, 32], strides = [1, 1]} : vector<8x128xf32> to vector<8x32xf32>
      %230 = arith.mulf %228, %229 : vector<8x32xf32>
      %c0_198 = arith.constant 0 : index
      %c0_199 = arith.constant 0 : index
      %c3_200 = arith.constant 3 : index
      %c0_201 = arith.constant 0 : index
      %231 = vector.load %arg7[%c0_198, %c0_199, %c3_200, %c0_201] : memref<1x8x4x32xf32, #tpu.memory_space<vmem>>, vector<1x8x1x32xf32>
      %232 = vector.shape_cast %231 : vector<1x8x1x32xf32> to vector<8x32xf32>
      %233 = vector.shape_cast %230 : vector<8x32xf32> to vector<1x8x1x32xf32>
      tpu.vector_store %arg7[%c0_198, %c0_199, %c3_200, %c0_201], %233 {strides = array<i32>} : memref<1x8x4x32xf32, #tpu.memory_space<vmem>>, vector<1x8x1x32xf32>,
    } else {
    }
    return
  }
  func.func @transform_0(%arg0: i32, %arg1: i32, %arg2: i32) -> (i32, i32, i32, i32) {
    %c0_i32 = arith.constant 0 : i32
    %c0_i32_0 = arith.constant 0 : i32
    %c0_i32_1 = arith.constant 0 : i32
    return %arg0, %arg1, %c0_i32, %c0_i32_0 : i32, i32, i32, i32
  }
  func.func @transform_1(%arg0: i32, %arg1: i32, %arg2: i32) -> (i32, i32, i32, i32) {
    %c0_i32 = arith.constant 0 : i32
    %c0_i32_0 = arith.constant 0 : i32
    %c0_i32_1 = arith.constant 0 : i32
    return %arg0, %arg2, %c0_i32, %c0_i32_0 : i32, i32, i32, i32
  }
  func.func @transform_2(%arg0: i32, %arg1: i32, %arg2: i32) -> (i32, i32, i32, i32) {
    %c0_i32 = arith.constant 0 : i32
    %c0_i32_0 = arith.constant 0 : i32
    %c0_i32_1 = arith.constant 0 : i32
    return %arg0, %arg2, %c0_i32, %c0_i32_0 : i32, i32, i32, i32
  }
  func.func @transform_3(%arg0: i32, %arg1: i32, %arg2: i32) -> (i32, i32, i32, i32) {
    %c0_i32 = arith.constant 0 : i32
    %c0_i32_0 = arith.constant 0 : i32
    return %arg0, %c0_i32, %arg1, %arg2 : i32, i32, i32, i32
  }
  func.func @transform_4(%arg0: i32, %arg1: i32, %arg2: i32) -> (i32, i32, i32, i32) {
    %c0_i32 = arith.constant 0 : i32
    %c0_i32_0 = arith.constant 0 : i32
    %c0_i32_1 = arith.constant 0 : i32
    return %arg0, %arg1, %c0_i32, %c0_i32_0 : i32, i32, i32, i32
  }
}

</mosaic_0001>

<bundles_post_ra>
// kernel: tpu_custom_call.1
= control target key start
LH: loop header
LB: loop body
LE: loop exit
PB: predicated region body
PF: predicated region fallthrough
CT: control target
= control target key end

     0   :  { %s3001_s0 = inlined_call_operand.hbm [shape: f32[2,8,4,32], index: 0, kind: input, shape index: {}]   ;;  %s3002_s1 = inlined_call_operand.hbm [shape: f32[2,8,4,32], index: 1, kind: input, shape index: {}]   ;;  %s3003_s2 = inlined_call_operand.hbm [shape: f32[2,8,4,32], index: 2, kind: input, shape index: {}]   ;;  %s3004_s3 = inlined_call_operand.vmem [shape: s32[2,1,8,8], index: 3, kind: input, shape index: {}]   ;;  %s3005_s4 = inlined_call_operand.hbm [shape: f32[2,8,4,32], index: 4, kind: output, shape index: {}]  }
   0x1   :  { %3012 = sst [smem:[#allocation19_spill]] %s3002_s1 }
   0x2   :  { %9 = vsyncpa [#allocation6], 0 }
   0x3   :  { %11 = vsyncpa [#allocation6 + $0x1], 0 }
   0x4   :  { %12 = vsyncpa [#allocation9], 0 }
   0x5   :  { %14 = vsyncpa [#allocation9 + $0x1], 0 }
   0x6   :  { %15 = vsyncpa [#allocation7], 0 }
   0x7   :  { %17 = vsyncpa [#allocation7 + $0x1], 0  ;;  %s2354_s15 = smov 0   ;;  %s2356_s16 = smov 0  }
   0x8   :  { %s2358_s17 = smov 0   ;;  %s2360_s18 = smov 0  }
   0x9   :  { %s2362_s19 = smov 0   ;;  %s2364_s20 = smov 0  }
   0xa LB: > { %3013 = sst [smem:[#allocation15_spill]] %s2312_s19  ;;  %s2385_s21 = sadd.s32 4294967295, %s2316_s20   ;;  %s2316_s20 = sphi %s2364_s20, %s23_s20   ;;  %s2312_s19 = sphi %s2362_s19, %s3030_s19   ;;  %s2308_s18 = sphi %s2360_s18, %s3029_s18   ;;  %s2304_s17 = sphi %s2358_s17, %s3033_s17   ;;  %s2300_s16 = sphi %s2356_s16, %s3032_s16   ;;  %s2296_s15 = sphi %s2354_s15, %s3031_s15  }
   0xb   : > { %s1950_s22 = sadd.s32 4294967294, %s2316_s20   ;;  %s42_s23 = sadd.s32 1, %s2312_s19 }
   0xc   : > { %s51_s24 = sadd.s32 1, %s2304_s17  ;;  %p44_p0 = scmp.ge.s32.totalorder %s42_s23, 2 }
   0xd   : > { %p58_p1 = scmp.ne.s32.totalorder %s2304_s17, %s2300_s16  ;;  %p59_p2 = scmp.eq.s32.totalorder %s2316_s20, 0 }
   0xe   : > { %p64_p3 = scmp.ne.s32.totalorder %s2300_s16, %s2296_s15  ;;  %s3035_s23 = smov (%p44_p0, %s42_s23), 0 }
   0xf   : > { %3014 = sst [smem:[#allocation16_spill]] %s3035_s23  ;;  %p2397_p4 = por %p59_p2, %p58_p1 }
  0x10   : > { %p65_p5 = scmp.eq.s32.totalorder %s2385_s21, 0  ;;  %s46_s26 = ssub.s32 %s2312_s19, %s3035_s23 }
  0x11   : > { %p176_p6 = scmp.eq.s32.totalorder %s2385_s21, 1  ;;  %p49_p7 = scmp.eq.s32.totalorder %s46_s26, 0 }
  0x12   : > { %p2405_p8 = por %p65_p5, %p64_p3  ;;  %p182_p10 = scmp.eq.s32.totalorder %s1950_s22, 1 }
  0x13   : > { %p2409_p9 = por %p176_p6, %p58_p1  ;;  %p2067_p13 = scmp.lt.s32.totalorder %s2316_s20, 2 }
  0x14   : > { %s2414_s29 = scalar_select %p49_p7, %s2304_s17, %s51_s24  }
  0x15   : > { %p2416_p11 = por %p182_p10, %p64_p3  ;;  %s3006_s5 = sand.u32 1, %s2304_s17  }
  0x16   : > { %3018 = sst [smem:[#allocation17_spill]] %s2414_s29  ;;  %s2425_s6 = sshll.u32 %s3006_s5, 5 }
  0x17   : > { %s3019_s30 = scalar_select %p2416_p11, 1, 0 }
  0x18   : > { %s2428_s7 = sshll.u32 %s2312_s19, 9  ;;  %p2432_p0 = pnand %p2067_p13, %p2397_p4 }
  0x19   : > { %3020 = sst [smem:[#allocation18_spill]] %s3019_s30  ;;  %s225_s9 = sand.u32 1, %s2316_s20  }
  0x1a   : > { %s3022_s1 = sld [smem:[#allocation19_spill]]  ;;  %s229_s13 = scalar_lea.vmem [#allocation8], %s2425_s6 }
  0x1b   : > { %s238_s14 = sshll.u32 %s229_s13, 4  ;;  %p1962_p1 = scmp.ge.s32.totalorder %s2316_s20, 1  ;;  %s239_s14 = int_to_ptr.vmem [resolvable:$true] %s238_s14 }
  0x1c   : > { %p282_p2 = scmp.lt.s32.totalorder %s2316_s20, 3  ;;  %s2444_s22 = scalar_lea.sflag [#allocation9], %s225_s9 }
  0x1d   : > { %p2150_p3 = pneg %p2432_p0  ;;  %s2161_s24 = scalar_lea.vmem %s239_s14, 512 }
  0x1e   : > { %p2162_p4 = scmp.ne.s32.totalorder %s239_s14, %s2161_s24  ;;  %s2318_s25 = smov [#allocation8]  }
  0x1f   : > { %s2166_s26 = sshll.u32 %s2318_s25, 4  ;;  %s2167_s26 = int_to_ptr.vmem [resolvable:$false] %s2166_s26 }
  0x20   : > { %s237_s12 = scalar_lea.hbm %s3022_s1, %s2428_s7  ;;  %p2164_p5 = pnand %p2162_p4, %p2150_p3 }
  0x21   : > { %s2168_s10 = scalar_lea.vmem %s2167_s26, 1024  ;;  %p2169_p7 = scmp.lt.s32.totalorder %s239_s14, %s2167_s26 }
  0x22   : > { %p2165_p6 = pneg %p2164_p5  ;;  %p2170_p10 = scmp.lt.s32.totalorder %s2168_s10, %s2161_s24 }
  0x24   : > { %p2171_p13 = por %p2170_p10, %p2169_p7 }
  0x26   : > { %p2172_p12 = pnand %p2171_p13, %p2165_p6 }
  0x28   : > { %2175 = shalt.err (!%p2172_p12)
}
  0x29   : > { %s3010_s11 = smov 64   ;;  %s2320_s9 = smov 4  }
  0x2a   : > { %2059 = dma.hbm_to_vmem [thread:$0]  (!%p2432_p0), %s237_s12, 512, %s239_s14, %s2444_s22, %s3010_s11, %s3010_s11, %s2320_s9  }
  0x2b   : > { %p2461_p4 = pnand %p1962_p1, %p282_p2  ;;  %s214_s26 = scalar_lea.hbm %s3001_s0, %s2428_s7 }
  0x2c   : > { %s206_s10 = scalar_lea.vmem [#allocation5], %s2425_s6  ;;  %s260_s19 = scalar_lea.hbm %s3003_s2, %s2428_s7 }
  0x2d   : > { %s215_s5 = sshll.u32 %s206_s10, 4  ;;  %s3024_s29 = sand.u32 1, %s2304_s17   ;;  %s216_s5 = int_to_ptr.vmem [resolvable:$true] %s215_s5 }
  0x2e   : > { %s203_s30 = scalar_lea.sflag [#allocation6], %s3024_s29  ;;  %s2189_s12 = scalar_lea.vmem %s216_s5, 512 }
  0x2f   : > { %p2190_p12 = scmp.ne.s32.totalorder %s216_s5, %s2189_s12  ;;  %s2321_s14 = smov [#allocation5]  }
  0x30   : > { %s2194_s11 = sshll.u32 %s2321_s14, 4  ;;  %s2195_s11 = int_to_ptr.vmem [resolvable:$false] %s2194_s11 }
  0x31   : > { %p2192_p1 = pnand %p2190_p12, %p2150_p3  ;;  %s2196_s24 = scalar_lea.vmem %s2195_s11, 1024 }
  0x32   : > { %p2197_p5 = scmp.lt.s32.totalorder %s216_s5, %s2195_s11  ;;  %p2198_p6 = scmp.lt.s32.totalorder %s2196_s24, %s2189_s12 }
  0x33   : > { %p2193_p2 = pneg %p2192_p1 }
  0x34   : > { %p2199_p7 = por %p2198_p6, %p2197_p5 }
  0x36   : > { %p2200_p10 = pnand %p2199_p7, %p2193_p2 }
  0x38   : > { %2203 = shalt.err (!%p2200_p10)
}
  0x39   : > { %s3025_s1 = smov 64   ;;  %s252_s23 = scalar_lea.vmem [#allocation10], %s2425_s6 }
  0x3a   : > { %2056 = dma.hbm_to_vmem [thread:$0]  (!%p2432_p0), %s214_s26, 512, %s216_s5, %s203_s30, %s3025_s1, %s3025_s1, %s2320_s9  }
  0x3b   : > { %s261_s29 = sshll.u32 %s252_s23, 4  ;;  %s2322_s11 = smov [#allocation10]   ;;  %s262_s29 = int_to_ptr.vmem [resolvable:$true] %s261_s29 }
  0x3c   : > { %s2217_s25 = scalar_lea.vmem %s262_s29, 512  ;;  %s2222_s10 = sshll.u32 %s2322_s11, 4  ;;  %s2223_s10 = int_to_ptr.vmem [resolvable:$false] %s2222_s10 }
  0x3d   : > { %p2218_p13 = scmp.ne.s32.totalorder %s262_s29, %s2217_s25  ;;  %s2224_s12 = scalar_lea.vmem %s2223_s10, 1024 }
  0x3e   : > { %p2225_p2 = scmp.lt.s32.totalorder %s262_s29, %s2223_s10  ;;  %p2226_p5 = scmp.lt.s32.totalorder %s2224_s12, %s2217_s25 }
  0x3f   : > { %p2220_p12 = pnand %p2218_p13, %p2150_p3 }
  0x40   : > { %p2227_p6 = por %p2226_p5, %p2225_p2 }
  0x41   : > { %p2221_p1 = pneg %p2220_p12 }
  0x43   : > { %p2228_p7 = pnand %p2227_p6, %p2221_p1 }
  0x45   : > { %2231 = shalt.err (!%p2228_p7)
}
  0x46   : > { %2062 = dma.hbm_to_vmem [thread:$0]  (!%p2432_p0), %s260_s19, 512, %s262_s29, %s2444_s22, %s3025_s1, %s3025_s1, %s2320_s9  }
  0x47   : > { %286 = sbr.rel (%p2461_p4) target bundleno = 1049 (0x419), region = 36  ;;  %s2502_s6 = sand.u32 (!%p2461_p4), 1, %s2300_s16  }
  0x48   : > { %s2505_s8 = sshll.u32 (!%p2461_p4), %s2502_s6, 5  ;;  %s289_s26 = scalar_lea.sflag (!%p2461_p4), [#allocation6], %s2502_s6 }
  0x49   : > { %s2509_s14 = scalar_lea.vmem (!%p2461_p4), [#allocation5], %s2505_s8 }
  0x4c   : > { %2283 = dma.done.wait (%p2405_p8), %s289_s26, 512  }
  0x4d   : > { %2285 = vsyncadd (%p2405_p8), %s289_s26, 4294966784  ;;  %s297_s19 = sand.u32 1, %s2385_s21   ;;  %s2517_s22 = scalar_lea.vmem [#allocation8], %s2505_s8 }
  0x4e   : > { %s298_s7 = scalar_lea.sflag [#allocation9], %s297_s19 }
  0x4f   : > { %2287 = dma.done.wait (%p2405_p8), %s298_s7, 1024  }
  0x50   : > { %2289 = vsyncadd (%p2405_p8), %s298_s7, 4294966272  ;;  %vm381_vm0 = vcmask 261120   ;;  %v2323_v0 = vmov 0.0   ;;  %vm2324_vm1 = vmmov 0   ;;  %vm419_vm2 = vcmask 1041409   ;;  %p358_p8 = scmp.lt.s32.totalorder %s2308_s18, 1 }
  0x51   : > { %2005 = vmatprep.subr.mxu0 %v2323_v0  ;;  %382 = vst.msk [vmem:[#allocation4] sm:$0xff] %vm381_vm0, %v2323_v0  ;;  %383 = vst.msk [vmem:[#allocation4 + $0x8] sm:$0xff] %vm381_vm0, %v2323_v0  ;;  %2010 = vmatprep.subr.mxu1 %v2323_v0  ;;  %vm422_vm3 = vcmask 1042434   ;;  %vm425_vm4 = vcmask 1043459   ;;  %vm428_vm5 = vcmask 1044484   ;;  %vm431_vm6 = vcmask 1045509  }
  0x52   : > { %384 = vst.msk [vmem:[#allocation4 + $0x10] sm:$0xff] %vm381_vm0, %v2323_v0  ;;  %385 = vst.msk [vmem:[#allocation4 + $0x18] sm:$0xff] %vm381_vm0, %v2323_v0  ;;  %2007 = vmatprep.mubr.msk.f32.mxu0 %vm2324_vm1, %v2323_v0  ;;  %2012 = vmatprep.mubr.msk.f32.mxu1 %vm2324_vm1, %v2323_v0  ;;  %vm434_vm7 = vcmask 1046534   ;;  %v402_v1 = vld [vmem:[%s2517_s22] sm:$0x1]  ;;  %vm437_vm8 = vcmask 1047559  }
  0x53   : > { %v403_v2 = vld [vmem:[%s2517_s22 + $0x4] sm:$0x1]  ;;  %v404_v3 = vld [vmem:[%s2517_s22 + $0x8] sm:$0x1]  ;;  %v405_v4 = vld [vmem:[%s2517_s22 + $0xc] sm:$0x1] }
  0x54   : > { %v406_v5 = vld [vmem:[%s2517_s22 + $0x10] sm:$0x1]  ;;  %v407_v6 = vld [vmem:[%s2517_s22 + $0x14] sm:$0x1]  ;;  %v408_v7 = vld [vmem:[%s2517_s22 + $0x18] sm:$0x1] }
  0x55   : > { %v409_v8 = vld [vmem:[%s2517_s22 + $0x1c] sm:$0x1]  ;;  %v447_v9 = vrot.slane %v403_v2, 7  ;;  %v449_v10 = vrot.slane %v404_v3, 6  ;;  %v451_v11 = vrot.slane %v405_v4, 5  ;;  %v453_v12 = vrot.slane %v406_v5, 4 }
  0x56   : > { %v455_v13 = vrot.slane %v407_v6, 3  ;;  %v386_v14 = vld [vmem:[%s2509_s14] sm:$0x1]  ;;  %v457_v16 = vrot.slane %v408_v7, 2  ;;  %v459_v17 = vrot.slane %v409_v8, 1  ;;  %s359_s21 = scalar_select %p358_p8, %s2308_s18, 1 }
  0x57   : > { %v448_v15 = vsel %vm419_vm2, %v447_v9, %v402_v1  ;;  %v387_v18 = vld [vmem:[%s2509_s14 + $0x4] sm:$0x1]  ;;  %v388_v19 = vld [vmem:[%s2509_s14 + $0x8] sm:$0x1]  ;;  %v389_v21 = vld [vmem:[%s2509_s14 + $0xc] sm:$0x1] }
  0x58   : > { %v450_v20 = vsel %vm422_vm3, %v449_v10, %v448_v15  ;;  %v390_v22 = vld [vmem:[%s2509_s14 + $0x10] sm:$0x1]  ;;  %v391_v23 = vld [vmem:[%s2509_s14 + $0x14] sm:$0x1]  ;;  %v392_v25 = vld [vmem:[%s2509_s14 + $0x18] sm:$0x1] }
  0x59   : > { %v452_v24 = vsel %vm425_vm4, %v451_v11, %v450_v20  ;;  %v393_v26 = vld [vmem:[%s2509_s14 + $0x1c] sm:$0x1]  ;;  %v394_v27 = vmul.f32 0.17677669, %v386_v14  ;;  %v395_v29 = vmul.f32 0.17677669, %v387_v18 }
  0x5a   : > { %v454_v28 = vsel %vm428_vm5, %v453_v12, %v452_v24  ;;  %v396_v30 = vmul.f32 0.17677669, %v388_v19  ;;  %v397_v31 = vmul.f32 0.17677669, %v389_v21  ;;  %v398_v33 = vmul.f32 0.17677669, %v390_v22 }
  0x5b   : > { %v456_v32 = vsel %vm431_vm6, %v455_v13, %v454_v28  ;;  %v399_v34 = vmul.f32 0.17677669, %v391_v23  ;;  %v400_v35 = vmul.f32 0.17677669, %v392_v25  ;;  %v401_v37 = vmul.f32 0.17677669, %v393_v26 }
  0x5c   : > { %v458_v36 = vsel %vm434_vm7, %v457_v16, %v456_v32  ;;  %v418_v38 = vrot.slane %v395_v29, 7  ;;  %v421_v39 = vrot.slane %v396_v30, 6  ;;  %v424_v41 = vrot.slane %v397_v31, 5  ;;  %s1967_s27 = sshll.u32 %s359_s21, 3  ;;  %s2587_s1 = scalar_lea.vmem [#allocation10], %s2505_s8 }
  0x5d   : > { %v460_v40 = vsel %vm437_vm8, %v459_v17, %v458_v36  ;;  %v427_v42 = vrot.slane %v398_v33, 4  ;;  %v430_v44 = vrot.slane %v399_v34, 3  ;;  %v433_v46 = vrot.slane %v400_v35, 2  ;;  %s367_s24 = scalar_lea.vmem %s3004_s3, %s1967_s27  ;;  %v558_v58 = vld [vmem:[%s2587_s1] sm:$0x1]  ;;  %s2850_s23 = scalar_lea.vmem [#allocation11], %s2505_s8 }
  0x5e   : > { %2006 = vmatpush3.xpose.msk.msra.mxu0 %vm381_vm0, %v460_v40  ;;  %v420_v43 = vsel %vm419_vm2, %v418_v38, %v394_v27  ;;  %v436_v48 = vrot.slane %v401_v37, 1  ;;  %v2577_v53 = vld [vmem:[%s367_s24] sm:$0xff]  ;;  %vm541_vm10 = vcmask 64512   ;;  %v560_v60 = vld [vmem:[%s2587_s1 + $0x8] sm:$0x1]  ;;  %vm1557_vm11 = vcmask 253952  }
  0x5f   : > { %v423_v45 = vsel %vm422_vm3, %v421_v39, %v420_v43  ;;  %2020 = vmatprep.subr.mxu0 %v2323_v0  ;;  %vm537_vm9 = vcmp.ne.s32.totalorder %v2577_v53, 0  ;;  %v559_v59 = vld [vmem:[%s2587_s1 + $0x4] sm:$0x1]  ;;  %v561_v61 = vld [vmem:[%s2587_s1 + $0xc] sm:$0x1]  ;;  %v576_v3 = vrot.slane %v560_v60, 6 }
  0x60   : > { %v426_v47 = vsel %vm425_vm4, %v424_v41, %v423_v45  ;;  %v562_v62 = vld [vmem:[%s2587_s1 + $0x10] sm:$0x1]  ;;  %v563_v63 = vld [vmem:[%s2587_s1 + $0x14] sm:$0x1]  ;;  %v564_v1 = vld [vmem:[%s2587_s1 + $0x18] sm:$0x1] }
  0x61   : > { %v429_v49 = vsel %vm428_vm5, %v427_v42, %v426_v47  ;;  %v574_v2 = vrot.slane %v559_v59, 7  ;;  %v565_v4 = vld [vmem:[%s2587_s1 + $0x1c] sm:$0x1]  ;;  %v578_v5 = vrot.slane %v561_v61, 5  ;;  %v580_v6 = vrot.slane %v562_v62, 4  ;;  %s1988_s29 = sshll.u32 %s2308_s18, 9 }
  0x62   : > { %v432_v50 = vsel %vm431_vm6, %v430_v44, %v429_v49  ;;  %v582_v8 = vrot.slane %v563_v63, 3  ;;  %v584_v10 = vrot.slane %v564_v1, 2  ;;  %v586_v12 = vrot.slane %v565_v4, 1  ;;  %v684_v17 = vld [vmem:[%s2517_s22 + $0x5] sm:$0x1]  ;;  %s1792_s25 = sshll.u32 %s2850_s23, 4  ;;  %s2943_s10 = scalar_lea.hbm %s3005_s4, %s1988_s29  ;;  %s2945_s25 = int_to_ptr.vmem [resolvable:$true] %s1792_s25 }
  0x63   : > { %v435_v51 = vsel %vm434_vm7, %v433_v46, %v432_v50  ;;  %v575_v7 = vsel %vm419_vm2, %v574_v2, %v558_v58  ;;  %v685_v18 = vld [vmem:[%s2517_s22 + $0x9] sm:$0x1]  ;;  %v686_v19 = vld [vmem:[%s2517_s22 + $0xd] sm:$0x1]  ;;  %v2609_v20 = vld [vmem:[%s2517_s22 + $0x11] sm:$0x1] }
  0x64   : > { %v438_v52 = vsel %vm437_vm8, %v436_v48, %v435_v51  ;;  %v577_v9 = vsel %vm422_vm3, %v576_v3, %v575_v7  ;;  %v721_v21 = vrot.slane %v684_v17, 7  ;;  %v668_v22 = vld [vmem:[%s2509_s14 + $0x5] sm:$0x1]  ;;  %v683_v23 = vld [vmem:[%s2517_s22 + $0x1] sm:$0x1]  ;;  %v723_v24 = vrot.slane %v685_v18, 6 }
  0x65   : > { %2008 = vmatmul.mubr.msk.f32.vlgmr.msra.gmra.mxu0 %vm381_vm0, %v438_v52  ;;  %v579_v11 = vsel %vm425_vm4, %v578_v5, %v577_v9  ;;  %v725_v25 = vrot.slane %v686_v19, 5  ;;  %v669_v26 = vld [vmem:[%s2509_s14 + $0x9] sm:$0x1]  ;;  %v670_v27 = vld [vmem:[%s2509_s14 + $0xd] sm:$0x1]  ;;  %v727_v38 = vrot.slane %v2609_v20, 4 }
  0x66   : > { %2022 = vmatprep.mubr.msk.f32.mxu0 %vm2324_vm1, %v2323_v0  ;;  %v581_v13 = vsel %vm428_vm5, %v580_v6, %v579_v11  ;;  %v2616_v28 = vld [vmem:[%s2517_s22 + $0x15] sm:$0x1]  ;;  %v2619_v29 = vld [vmem:[%s2517_s22 + $0x19] sm:$0x1]  ;;  %v667_v30 = vld [vmem:[%s2509_s14 + $0x1] sm:$0x1]  ;;  %v722_v42 = vsel %vm419_vm2, %v721_v21, %v683_v23 }
  0x67   : > { %v583_v14 = vsel %vm431_vm6, %v582_v8, %v581_v13  ;;  %v671_v31 = vld [vmem:[%s2509_s14 + $0x11] sm:$0x1]  ;;  %v2624_v32 = vld [vmem:[%s2517_s22 + $0x1d] sm:$0x1]  ;;  %v672_v33 = vld [vmem:[%s2509_s14 + $0x15] sm:$0x1] }
  0x68   : > { %v585_v15 = vsel %vm434_vm7, %v584_v10, %v583_v14  ;;  %v673_v34 = vld [vmem:[%s2509_s14 + $0x19] sm:$0x1]  ;;  %v676_v35 = vmul.f32 0.17677669, %v668_v22  ;;  %v677_v36 = vmul.f32 0.17677669, %v669_v26 }
  0x69   : > { %v587_v16 = vsel %vm437_vm8, %v586_v12, %v585_v15  ;;  %v2628_v37 = vmul.f32 0.17677669, %v670_v27  ;;  %v729_v39 = vrot.slane %v2616_v28, 3  ;;  %v674_v40 = vld [vmem:[%s2509_s14 + $0x1d] sm:$0x1]  ;;  %v731_v43 = vrot.slane %v2619_v29, 2 }
  0x6a   : > { %2011 = vmatpush3.msra.mxu1 %v587_v16  ;;  %v2633_v41 = vmul.f32 0.17677669, %v671_v31  ;;  %v733_v44 = vrot.slane %v2624_v32, 1  ;;  %v959_v45 = vld [vmem:[%s2517_s22 + $0x6] sm:$0x1]  ;;  %v699_v51 = vrot.slane %v676_v35, 7 }
  0x6b   : > { %2015 = vmatprep.subr.mxu1 %v2323_v0  ;;  %v943_v46 = vld [vmem:[%s2509_s14 + $0x6] sm:$0x1]  ;;  %v675_v47 = vmul.f32 0.17677669, %v667_v30  ;;  %v2640_v48 = vmul.f32 0.17677669, %v672_v33 }
  0x6c   : > { %v2642_v49 = vmul.f32 0.17677669, %v673_v34  ;;  %v2644_v50 = vmul.f32 0.17677669, %v674_v40  ;;  %v701_v52 = vrot.slane %v677_v36, 6  ;;  %v705_v58 = vrot.slane %v2633_v41, 4 }
  0x6d   : > { %v960_v59 = vld [vmem:[%s2517_s22 + $0xa] sm:$0x1]  ;;  %v996_v60 = vrot.slane %v959_v45, 7  ;;  %v951_v61 = vmul.f32 0.17677669, %v943_v46  ;;  %v707_v2 = vrot.slane %v2640_v48, 3  ;;  %v700_v8 = vsel %vm419_vm2, %v699_v51, %v675_v47 }
  0x6e   : > { %v942_v63 = vld [vmem:[%s2509_s14 + $0x2] sm:$0x1]  ;;  %v944_v1 = vld [vmem:[%s2509_s14 + $0xa] sm:$0x1]  ;;  %v709_v3 = vrot.slane %v2642_v49, 2  ;;  %v998_v12 = vrot.slane %v960_v59, 6 }
  0x6f   : > { %v958_v4 = vld [vmem:[%s2517_s22 + $0x2] sm:$0x1]  ;;  %v1218_v5 = vld [vmem:[%s2509_s14 + $0x7] sm:$0x1]  ;;  %v961_v9 = vld [vmem:[%s2517_s22 + $0xe] sm:$0x1] }
  0x70   : > { %v945_v10 = vld [vmem:[%s2509_s14 + $0xe] sm:$0x1]  ;;  %v1234_v11 = vld [vmem:[%s2517_s22 + $0x7] sm:$0x1]  ;;  %v950_v13 = vmul.f32 0.17677669, %v942_v63  ;;  %v997_v17 = vsel %vm419_vm2, %v996_v60, %v958_v4 }
  0x71   : > { %v952_v14 = vmul.f32 0.17677669, %v944_v1  ;;  %v974_v15 = vrot.slane %v951_v61, 7  ;;  %v1226_v18 = vmul.f32 0.17677669, %v1218_v5  ;;  %v1000_v20 = vrot.slane %v961_v9, 5 }
  0x72   : > { %v962_v19 = vld [vmem:[%s2517_s22 + $0x12] sm:$0x1]  ;;  %v1235_v21 = vld [vmem:[%s2517_s22 + $0xb] sm:$0x1]  ;;  %v1271_v22 = vrot.slane %v1234_v11, 7  ;;  %v999_v31 = vsel %vm422_vm3, %v998_v12, %v997_v17  ;;  %s1777_s12 = scalar_lea.sflag [#allocation7], %s2502_s6 }
  0x73   : > { %v1217_v23 = vld [vmem:[%s2509_s14 + $0x3] sm:$0x1]  ;;  %v946_v26 = vld [vmem:[%s2509_s14 + $0x12] sm:$0x1]  ;;  %v953_v27 = vmul.f32 0.17677669, %v945_v10  ;;  %v975_v36 = vsel %vm419_vm2, %v974_v15, %v950_v13  ;;  %v1001_v1 = vsel %vm425_vm4, %v1000_v20, %v999_v31 }
  0x74   : > { %v1233_v30 = vld [vmem:[%s2517_s22 + $0x3] sm:$0x1]  ;;  %v976_v33 = vrot.slane %v952_v14, 6  ;;  %v1220_v34 = vld [vmem:[%s2509_s14 + $0xf] sm:$0x1]  ;;  %v1273_v40 = vrot.slane %v1235_v21, 6 }
  0x75   : > { %v963_v46 = vld [vmem:[%s2517_s22 + $0x16] sm:$0x1]  ;;  %v954_v51 = vmul.f32 0.17677669, %v946_v26  ;;  %v1002_v59 = vrot.slane %v962_v19, 4  ;;  %v978_v60 = vrot.slane %v953_v27, 5 }
  0x76   : > { %v947_v47 = vld [vmem:[%s2509_s14 + $0x16] sm:$0x1]  ;;  %v1221_v61 = vld [vmem:[%s2509_s14 + $0x13] sm:$0x1]  ;;  %v1228_v63 = vmul.f32 0.17677669, %v1220_v34  ;;  %v977_v28 = vsel %vm422_vm3, %v976_v33, %v975_v36 }
  0x77   : > { %v1237_v4 = vld [vmem:[%s2517_s22 + $0x13] sm:$0x1]  ;;  %v1004_v12 = vrot.slane %v963_v46, 3  ;;  %v980_v13 = vrot.slane %v954_v51, 4  ;;  %v1222_v14 = vld [vmem:[%s2509_s14 + $0x17] sm:$0x1]  ;;  %v979_v15 = vsel %vm425_vm4, %v978_v60, %v977_v28 }
  0x78   : > { %v1229_v29 = vmul.f32 0.17677669, %v1221_v61  ;;  %v1277_v17 = vrot.slane %v1237_v4, 4  ;;  %v965_v41 = vld [vmem:[%s2517_s22 + $0x1e] sm:$0x1]  ;;  %v711_v33 = vrot.slane %v2644_v50, 1 }
  0x79   : > { %v949_v19 = vld [vmem:[%s2509_s14 + $0x1e] sm:$0x1]  ;;  %v1230_v26 = vmul.f32 0.17677669, %v1222_v14  ;;  %v1239_v27 = vld [vmem:[%s2517_s22 + $0x1b] sm:$0x1] }
  0x7a   : > { %v1255_v31 = vrot.slane %v1229_v29, 4  ;;  %v957_v34 = vmul.f32 0.17677669, %v949_v19  ;;  %v1008_v36 = vrot.slane %v965_v41, 1  ;;  %v1281_v50 = vrot.slane %v1239_v27, 2  ;;  %s2232_s30 = scalar_lea.vmem %s2945_s25, 512 }
  0x7b   : > { %v1257_v51 = vrot.slane %v1230_v26, 3  ;;  %v835_v26 = vld [vmem:[%s2587_s1 + $0xd] sm:$0x1]  ;;  %v837_v53 = vld [vmem:[%s2587_s1 + $0x15] sm:$0x1]  ;;  %p2233_p0 = scmp.ne.s32.totalorder %s2945_s25, %s2232_s30  ;;  %s2326_s5 = smov [#allocation11]  }
  0x7c   : > { %s2236_s8 = sshll.u32 %s2326_s5, 4  ;;  %s2237_s8 = int_to_ptr.vmem [resolvable:$false] %s2236_s8 }
  0x7d   : > { %p2234_p3 = pnand %p2233_p0, %p2409_p9  ;;  %s2238_s26 = scalar_lea.vmem %s2237_s8, 1024 }
  0x7e   : > { %p2239_p10 = scmp.lt.s32.totalorder %s2945_s25, %s2237_s8  ;;  %p2240_p13 = scmp.lt.s32.totalorder %s2238_s26, %s2232_s30 }
  0x7f   : > { %p2235_p4 = pneg %p2234_p3 }
  0x80   : > { %p2241_p12 = por %p2240_p13, %p2239_p10 }
  0x82   : > { %p2242_p1 = pnand %p2241_p12, %p2235_p4 }
 0x125   : > { %v532_v54 = vpop.f32.mrf.mxu0 }
 0x126   : > { %v2582_v55 = vsel %vm537_vm9, %v532_v54, -4.0704336  ;;  %v703_v54 = vrot.slane %v2628_v37, 5  ;;  %v1236_v37 = vld [vmem:[%s2517_s22 + $0xf] sm:$0x1] }
 0x127   : > { %v2009_v56 = vpop.f32.mrf.mxu0  ;;  %v542_v57 = vsel %vm541_vm10, %v2582_v55, -inf }
 0x128   : > { %543 = vmax.xlane.f32.xlu0 %v542_v57  ;;  %v724_v57 = vsel %vm422_vm3, %v723_v24, %v722_v42  ;;  %v1249_v42 = vrot.slane %v1226_v18, 7 }
 0x129   : > { %v726_v7 = vsel %vm425_vm4, %v725_v25, %v724_v57  ;;  %v702_v25 = vsel %vm422_vm3, %v701_v52, %v700_v8  ;;  %v1272_v52 = vsel %vm419_vm2, %v1271_v22, %v1233_v30  ;;  %v955_v8 = vmul.f32 0.17677669, %v947_v47  ;;  %v1240_v47 = vld [vmem:[%s2517_s22 + $0x1f] sm:$0x1] }
 0x12a   : > { %v728_v24 = vsel %vm428_vm5, %v727_v38, %v726_v7  ;;  %v1225_v38 = vmul.f32 0.17677669, %v1217_v23  ;;  %v704_v57 = vsel %vm425_vm4, %v703_v54, %v702_v25  ;;  %v964_v7 = vld [vmem:[%s2517_s22 + $0x1a] sm:$0x1]  ;;  %v1274_v9 = vsel %vm422_vm3, %v1273_v40, %v1272_v52  ;;  %v1223_v25 = vld [vmem:[%s2509_s14 + $0x1b] sm:$0x1] }
 0x12b   : > { %v730_v45 = vsel %vm431_vm6, %v729_v39, %v728_v24  ;;  %v1275_v39 = vrot.slane %v1236_v37, 5  ;;  %v948_v54 = vld [vmem:[%s2509_s14 + $0x1a] sm:$0x1]  ;;  %v706_v11 = vsel %vm428_vm5, %v705_v58, %v704_v57  ;;  %v1006_v23 = vrot.slane %v964_v7, 2  ;;  %v1224_v40 = vld [vmem:[%s2509_s14 + $0x1f] sm:$0x1] }
 0x12c   : > { %v1250_v10 = vsel %vm419_vm2, %v1249_v42, %v1225_v38  ;;  %v956_v58 = vmul.f32 0.17677669, %v948_v54  ;;  %v708_v22 = vsel %vm431_vm6, %v707_v2, %v706_v11  ;;  %v982_v24 = vrot.slane %v955_v8, 3  ;;  %v662_v11 = vld [vmem:[#allocation4] sm:$0xff] }
 0x12d   : > { %v1276_v20 = vsel %vm425_vm4, %v1275_v39, %v1274_v9  ;;  %v1231_v38 = vmul.f32 0.17677669, %v1223_v25  ;;  %v986_v57 = vrot.slane %v957_v34, 1  ;;  %v832_v25 = vld [vmem:[%s2587_s1 + $0x1] sm:$0x1] }
 0x12e   : > { %v1278_v48 = vsel %vm428_vm5, %v1277_v17, %v1276_v20  ;;  %v984_v37 = vrot.slane %v956_v58, 2  ;;  %v838_v34 = vld [vmem:[%s2587_s1 + $0x19] sm:$0x1] }
 0x1b1   : > { %v2647_v56 = vpop.xlane.xlu0 %543 }
 0x1b2   : > { %v545_v62 = vmax.f32 %v2647_v56, -1e+30 }
 0x1b4   : > { %v549_v6 = vsub.f32 %v2582_v55, %v545_v62  ;;  %v1219_v55 = vld [vmem:[%s2509_s14 + $0xb] sm:$0x1]  ;;  %v546_v8 = vsub.f32 -1e+30, %v545_v62 }
 0x1b5   : > { %v1227_v35 = vmul.f32 0.17677669, %v1219_v55  ;;  %v1253_v55 = vrot.slane %v1228_v63, 5  ;;  %v1283_v63 = vrot.slane %v1240_v47, 1  ;;  %v1109_v47 = vld [vmem:[%s2587_s1 + $0xa] sm:$0x1] }
 0x1b6   : > { %v550_v16 = vmul.f32 1.442695, %v549_v6  ;;  %v732_v6 = vsel %vm434_vm7, %v731_v43, %v730_v45  ;;  %v1003_v43 = vsel %vm428_vm5, %v1002_v59, %v1001_v1  ;;  %v1232_v59 = vmul.f32 0.17677669, %v1224_v40 }
 0x1b7   : > { %v1251_v5 = vrot.slane %v1227_v35, 6  ;;  %v734_v18 = vsel %vm437_vm8, %v733_v44, %v732_v6  ;;  %v1005_v32 = vsel %vm431_vm6, %v1004_v12, %v1003_v43  ;;  %v981_v44 = vsel %vm428_vm5, %v980_v13, %v979_v15 }
 0x1b8   : > { %2124 = vpow2.f32 %v550_v16  ;;  %v1238_v16 = vld [vmem:[%s2517_s22 + $0x17] sm:$0x1]  ;;  %v710_v35 = vsel %vm434_vm7, %v709_v3, %v708_v22  ;;  %v1007_v45 = vsel %vm434_vm7, %v1006_v23, %v1005_v32  ;;  %v983_v46 = vsel %vm431_vm6, %v982_v24, %v981_v44  ;;  %v833_v22 = vld [vmem:[%s2587_s1 + $0x5] sm:$0x1]  ;;  %v834_v23 = vld [vmem:[%s2587_s1 + $0x9] sm:$0x1] }
 0x1b9   : > { %v1252_v21 = vsel %vm422_vm3, %v1251_v5, %v1250_v10  ;;  %v1279_v30 = vrot.slane %v1238_v16, 3  ;;  %v712_v3 = vsel %vm437_vm8, %v711_v33, %v710_v35  ;;  %v1009_v60 = vsel %vm437_vm8, %v1008_v36, %v1007_v45  ;;  %v836_v44 = vld [vmem:[%s2587_s1 + $0x11] sm:$0x1]  ;;  %v839_v35 = vld [vmem:[%s2587_s1 + $0x1d] sm:$0x1] }
 0x1ba   : > { %v1254_v2 = vsel %vm425_vm4, %v1253_v55, %v1252_v21  ;;  %v985_v61 = vsel %vm434_vm7, %v984_v37, %v983_v46  ;;  %v1259_v1 = vrot.slane %v1231_v38, 2  ;;  %v1261_v5 = vrot.slane %v1232_v59, 1  ;;  %v1108_v46 = vld [vmem:[%s2587_s1 + $0x6] sm:$0x1]  ;;  %v1110_v59 = vld [vmem:[%s2587_s1 + $0xe] sm:$0x1] }
 0x1bb   : > { %v1280_v52 = vsel %vm431_vm6, %v1279_v30, %v1278_v48  ;;  %v1256_v49 = vsel %vm428_vm5, %v1255_v31, %v1254_v2  ;;  %v987_v39 = vsel %vm437_vm8, %v986_v57, %v985_v61  ;;  %v547_v9 = vmul.f32 1.442695, %v546_v8 }
 0x1bc   : > { %v1282_v28 = vsel %vm434_vm7, %v1281_v50, %v1280_v52  ;;  %v1258_v4 = vsel %vm431_vm6, %v1257_v51, %v1256_v49  ;;  %v848_v24 = vrot.slane %v833_v22, 7  ;;  %v850_v32 = vrot.slane %v834_v23, 6  ;;  %v1107_v51 = vld [vmem:[%s2587_s1 + $0x2] sm:$0x1]  ;;  %v1383_v52 = vld [vmem:[%s2587_s1 + $0x7] sm:$0x1] }
 0x1bd   : > { %v1284_v6 = vsel %vm437_vm8, %v1283_v63, %v1282_v28  ;;  %v1260_v7 = vsel %vm434_vm7, %v1259_v1, %v1258_v4  ;;  %2126 = vpow2.f32 %v547_v9  ;;  %v852_v30 = vrot.slane %v835_v26, 5  ;;  %v1382_v4 = vld [vmem:[%s2587_s1 + $0x3] sm:$0x1]  ;;  %v1387_v22 = vld [vmem:[%s2587_s1 + $0x17] sm:$0x1] }
 0x1be   : > { %v1262_v54 = vsel %vm437_vm8, %v1261_v5, %v1260_v7  ;;  %v849_v27 = vsel %vm419_vm2, %v848_v24, %v832_v25  ;;  %v854_v33 = vrot.slane %v836_v44, 4  ;;  %v856_v2 = vrot.slane %v837_v53, 3 }
 0x1bf   : > { %v851_v31 = vsel %vm422_vm3, %v850_v32, %v849_v27  ;;  %v858_v37 = vrot.slane %v838_v34, 2  ;;  %v860_v38 = vrot.slane %v839_v35, 1  ;;  %v1123_v50 = vrot.slane %v1108_v46, 7  ;;  %v1114_v27 = vld [vmem:[%s2587_s1 + $0x1e] sm:$0x1] }
 0x1c0   : > { %v853_v48 = vsel %vm425_vm4, %v852_v30, %v851_v31  ;;  %v1398_v63 = vrot.slane %v1383_v52, 7  ;;  %v1127_v7 = vrot.slane %v1110_v59, 5  ;;  %v2325_v25 = vmov 1966171168   ;;  %v1388_v31 = vld [vmem:[%s2587_s1 + $0x1b] sm:$0x1] }
 0x1c1   : > { %v855_v36 = vsel %vm428_vm5, %v854_v33, %v853_v48  ;;  %v1124_v61 = vsel %vm419_vm2, %v1123_v50, %v1107_v51  ;;  %v1502_v26 = vunpack.c.l.s4 %v2325_v25  ;;  %v1504_v32 = vlaneseq }
 0x1c2   : > { %v857_v40 = vsel %vm431_vm6, %v856_v2, %v855_v36  ;;  %v1406_v33 = vrot.slane %v1387_v22, 3  ;;  %v1135_v34 = vrot.slane %v1114_v27, 1  ;;  %v1389_v36 = vld [vmem:[%s2587_s1 + $0x1f] sm:$0x1] }
 0x1c3   : > { %v1503_v48 = vunpack.c.0.s8 %v1502_v26  ;;  %v1505_v2 = vshrl.u32 %v1504_v32, 7 }
 0x1c5   : > { %v2125_v42 = vpop.eup %2124  ;;  %v2831_v46 = vsub.s32 %v1503_v48, %v1505_v2 }
 0x1c6   : > { %2013 = vmatmul.mubr.msk.f32.vlgmr.msra.gmra.mxu1 %vm541_vm10, %v2125_v42  ;;  %v553_v41 = vsel %vm541_vm10, %v2125_v42, 0.0  ;;  %v859_v42 = vsel %vm434_vm7, %v858_v37, %v857_v40  ;;  %v1408_v37 = vrot.slane %v1388_v31, 2 }
 0x1c7   : > { %2016 = vmatpush3.xpose.msk.msra.mxu1 %vm381_vm0, %v734_v18  ;;  %2017 = vmatprep.mubr.msk.f32.mxu1 %vm2324_vm1, %v2323_v0  ;;  %v861_v45 = vsel %vm437_vm8, %v860_v38, %v859_v42  ;;  %v1410_v42 = vrot.slane %v1389_v36, 1 }
 0x1c8   : > { %2025 = vmatprep.subr.mxu1 %v2323_v0  ;;  %2021 = vmatpush3.msra.mxu0 %v861_v45 }
 0x1c9   : > { %2030 = vmatprep.subr.mxu0 %v2323_v0 }
 0x1ca   : > { %2018 = vmatmul.mubr.msk.f32.vlgmr.msra.gmra.mxu1 %vm381_vm0, %v712_v3  ;;  %v2127_v10 = vpop.eup %2126  ;;  %v1125_v3 = vrot.slane %v1109_v47, 6 }
 0x1cb   : > { %2026 = vmatpush3.xpose.msk.msra.mxu1 %vm381_vm0, %v1009_v60  ;;  %2027 = vmatprep.mubr.msk.f32.mxu1 %vm2324_vm1, %v2323_v0  ;;  %v663_v12 = vmul.f32 %v2127_v10, %v662_v11  ;;  %v1384_v60 = vld [vmem:[%s2587_s1 + $0xb] sm:$0x1]  ;;  %v552_v28 = vmul.f32 0.0, %v2127_v10 }
 0x1cc   : > { %2035 = vmatprep.subr.mxu1 %v2323_v0 }
 0x1ce   : > { %2028 = vmatmul.mubr.msk.f32.vlgmr.msra.gmra.mxu1 %vm381_vm0, %v987_v39 }
 0x1cf   : > { %2036 = vmatpush3.xpose.msk.msra.mxu1 %vm381_vm0, %v1284_v6  ;;  %2037 = vmatprep.mubr.msk.f32.mxu1 %vm2324_vm1, %v2323_v0  ;;  %v1111_v6 = vld [vmem:[%s2587_s1 + $0x12] sm:$0x1] }
 0x1d2   : > { %2038 = vmatmul.mubr.msk.f32.vlgmr.msra.gmra.mxu1 %vm381_vm0, %v1262_v54  ;;  %v1400_v54 = vrot.slane %v1384_v60, 6 }
 0x286   : > { %v658_v13 = vpop.f32.mrf.mxu1 }
 0x287   : > { %v664_v14 = vadd.f32 %v663_v12, %v658_v13  ;;  %v1126_v12 = vsel %vm422_vm3, %v1125_v3, %v1124_v61  ;;  %v1385_v13 = vld [vmem:[%s2587_s1 + $0xf] sm:$0x1] }
 0x288   : > { %v2014_v29 = vpop.f32.mrf.mxu1 }
 0x289   : > { %665 = vst.msk [vmem:[#allocation4] sm:$0xff] %vm381_vm0, %v664_v14  ;;  %v1399_v14 = vsel %vm419_vm2, %v1398_v63, %v1382_v4  ;;  %v1112_v29 = vld [vmem:[%s2587_s1 + $0x16] sm:$0x1] }
 0x28a   : > { %v805_v43 = vpop.f32.mrf.mxu1 }
 0x28b   : > { %v811_v15 = vsel %vm537_vm9, %v805_v43, -4.0704336  ;;  %v1129_v43 = vrot.slane %v1111_v6, 4 }
 0x28c   : > { %v2019_v16 = vpop.f32.mrf.mxu1  ;;  %v816_v56 = vsel %vm541_vm10, %v811_v15, -inf }
 0x28d   : > { %817 = vmax.xlane.f32.xlu0 %v816_v56  ;;  %v1128_v16 = vsel %vm425_vm4, %v1127_v7, %v1126_v12  ;;  %v1386_v56 = vld [vmem:[%s2587_s1 + $0x13] sm:$0x1] }
 0x28e   : > { %v1080_v62 = vpop.f32.mrf.mxu1  ;;  %v1404_v23 = vrot.slane %v1386_v56, 4 }
 0x28f   : > { %v1086_v17 = vsel %vm537_vm9, %v1080_v62, -4.0704336  ;;  %v1402_v62 = vrot.slane %v1385_v13, 5 }
 0x290   : > { %v2029_v55 = vpop.f32.mrf.mxu1  ;;  %v1091_v18 = vsel %vm541_vm10, %v1086_v17, -inf  ;;  %v1497_v51 = vld [vmem:[#allocation4] sm:$0xff] }
 0x291   : > { %1092 = vmax.xlane.f32.xlu1 %v1091_v18  ;;  %554 = vadd.xlane.f32.xlu0 %v553_v41  ;;  %v1401_v41 = vsel %vm422_vm3, %v1400_v54, %v1399_v14 }
 0x292   : > { %v1355_v19 = vpop.f32.mrf.mxu1  ;;  %v1403_v24 = vsel %vm425_vm4, %v1402_v62, %v1401_v41 }
 0x293   : > { %v2767_v58 = vsel %vm537_vm9, %v1355_v19, -4.0704336  ;;  %v1113_v19 = vld [vmem:[%s2587_s1 + $0x1a] sm:$0x1] }
 0x294   : > { %v2039_v20 = vpop.f32.mrf.mxu1  ;;  %v1366_v21 = vsel %vm541_vm10, %v2767_v58, -inf  ;;  %v1133_v30 = vrot.slane %v1113_v19, 2 }
 0x295   : > { %1367 = vmax.xlane.f32.xlu1 %v1366_v21  ;;  %v1130_v21 = vsel %vm428_vm5, %v1129_v43, %v1128_v16 }
 0x316   : > { %v2791_v49 = vpop.xlane.xlu0 %817 }
 0x317   : > { %v819_v57 = vmax.f32 %v2791_v49, -1e+30 }
 0x319   : > { %v823_v1 = vsub.f32 %v811_v15, %v819_v57 }
 0x31a   : > { %v2800_v39 = vpop.xlane.xlu1 %1092  ;;  %v555_v5 = vpop.xlane.xlu0 %554 }
 0x31b   : > { %v824_v8 = vmul.f32 1.442695, %v823_v1  ;;  %v1094_v9 = vmax.f32 %v2800_v39, -1e+30  ;;  %v556_v11 = vadd.f32 %v555_v5, %v552_v28 }
 0x31d   : > { %v1098_v10 = vsub.f32 %v1086_v17, %v1094_v9  ;;  %2128 = vpow2.f32 %v824_v8  ;;  %v1131_v17 = vrot.slane %v1112_v29, 3  ;;  %v820_v29 = vsub.f32 -1e+30, %v819_v57 }
 0x31e   : > { %v2810_v15 = vpop.xlane.xlu1 %1367  ;;  %2130 = vrcp.f32 %v556_v11  ;;  %v1095_v16 = vsub.f32 -1e+30, %v1094_v9 }
 0x31f   : > { %v1099_v55 = vmul.f32 1.442695, %v1098_v10  ;;  %v1369_v18 = vmax.f32 %v2810_v15, -1e+30  ;;  %v1132_v53 = vsel %vm431_vm6, %v1131_v17, %v1130_v21  ;;  %v821_v43 = vmul.f32 1.442695, %v820_v29 }
 0x320   : > { %v1134_v35 = vsel %vm434_vm7, %v1133_v30, %v1132_v53  ;;  %v1096_v56 = vmul.f32 1.442695, %v1095_v16  ;;  %v1212_v15 = vld [vmem:[#allocation4 + $0x10] sm:$0xff]  ;;  %v1487_v53 = vld [vmem:[#allocation4 + $0x18] sm:$0xff] }
 0x321   : > { %v1373_v20 = vsub.f32 %v2767_v58, %v1369_v18  ;;  %2132 = vpow2.f32 %v1099_v55  ;;  %v1405_v58 = vsel %vm428_vm5, %v1404_v23, %v1403_v24  ;;  %v1136_v38 = vsel %vm437_vm8, %v1135_v34, %v1134_v35  ;;  %v937_v23 = vld [vmem:[#allocation4 + $0x8] sm:$0xff] }
 0x322   : > { %v1407_v40 = vsel %vm431_vm6, %v1406_v33, %v1405_v58  ;;  %v1370_v62 = vsub.f32 -1e+30, %v1369_v18 }
 0x323   : > { %v1374_v44 = vmul.f32 1.442695, %v1373_v20  ;;  %v1409_v47 = vsel %vm434_vm7, %v1408_v37, %v1407_v40 }
 0x324   : > { %v1411_v59 = vsel %vm437_vm8, %v1410_v42, %v1409_v47  ;;  %v1371_v55 = vmul.f32 1.442695, %v1370_v62 }
 0x325   : > { %2134 = vpow2.f32 %v1374_v44 }
 0x326   : > { %2136 = vpow2.f32 %v821_v43 }
 0x327   : > { %2138 = vpow2.f32 %v1096_v56 }
 0x328   : > { %2140 = vpow2.f32 %v1371_v55 }
 0x32a   : > { %v2129_v45 = vpop.eup %2128 }
 0x32b   : > { %v2131_v50 = vpop.eup %2130  ;;  %2023 = vmatmul.mubr.msk.f32.vlgmr.msra.gmra.mxu0 %vm541_vm10, %v2129_v45  ;;  %v827_v52 = vsel %vm541_vm10, %v2129_v45, 0.0 }
 0x32c   : > { %v1498_v3 = vmul.f32 %v2131_v50, %v1497_v51  ;;  %2031 = vmatpush3.msra.mxu0 %v1136_v38  ;;  %828 = vadd.xlane.f32.xlu1 %v827_v52 }
 0x32d   : > { %2032 = vmatprep.mubr.msk.f32.mxu0 %vm2324_vm1, %v2323_v0  ;;  %2040 = vmatprep.subr.mxu0 %v2323_v0 }
 0x32e   : > { %v2133_v60 = vpop.eup %2132  ;;  %v1500_v61 = vcombine.high %v1498_v3, %v1498_v3  ;;  %v1507_v63 = vrot.slane %v1498_v3, %v2831_v46 }
 0x32f   : > { %2033 = vmatmul.mubr.msk.f32.vlgmr.msra.gmra.mxu0 %vm541_vm10, %v2133_v60  ;;  %v1102_v1 = vsel %vm541_vm10, %v2133_v60, 0.0 }
 0x330   : > { %v1514_v28 = vrot.slane %v1500_v61, %v2831_v46  ;;  %v1515_v4 = vcombine.high %v1507_v63, %v1507_v63  ;;  %v1523_v5 = vrot.slane %v1507_v63, %v2831_v46  ;;  %2041 = vmatpush3.msra.mxu0 %v1411_v59  ;;  %1103 = vadd.xlane.f32.xlu0 %v1102_v1 }
 0x331   : > { %2042 = vmatprep.mubr.msk.f32.mxu0 %vm2324_vm1, %v2323_v0 }
 0x332   : > { %v2135_v6 = vpop.eup %2134  ;;  %v1516_v7 = vcombine.high %v1514_v28, %v1514_v28  ;;  %v1530_v54 = vrot.slane %v1514_v28, %v2831_v46  ;;  %v1537_v8 = vrot.slane %v1515_v4, %v2831_v46  ;;  %v1545_v11 = vcombine.high %v1523_v5, %v1523_v5  ;;  %1558 = vst.msk [vmem:[%s2850_s23] sm:$0x1] %vm1557_vm11, %v1523_v5 }
 0x333   : > { %2043 = vmatmul.mubr.msk.f32.vlgmr.msra.gmra.mxu0 %vm541_vm10, %v2135_v6  ;;  %v1377_v0 = vsel %vm541_vm10, %v2135_v6, 0.0  ;;  %v2137_v41 = vpop.eup %2136 }
 0x334   : > { %v1544_v12 = vrot.slane %v1516_v7, %v2831_v46  ;;  %v1546_v13 = vcombine.high %v1530_v54, %v1530_v54  ;;  %v1547_v14 = vcombine.high %v1537_v8, %v1537_v8  ;;  %1559 = vst.msk [vmem:[%s2850_s23 + $0x4] sm:$0x1] %vm1557_vm11, %v1537_v8  ;;  %1560 = vst.msk [vmem:[%s2850_s23 + $0x8] sm:$0x1] %vm1557_vm11, %v1545_v11  ;;  %1378 = vadd.xlane.f32.xlu1 %v1377_v0  ;;  %v2139_v20 = vpop.eup %2138 }
 0x335   : > { %1562 = vst.msk [vmem:[%s2850_s23 + $0x10] sm:$0x1] %vm1557_vm11, %v1530_v54  ;;  %v826_v17 = vmul.f32 0.0, %v2137_v41  ;;  %v1101_v49 = vmul.f32 0.0, %v2139_v20  ;;  %v2141_v57 = vpop.eup %2140  ;;  %v938_v25 = vmul.f32 %v2137_v41, %v937_v23  ;;  %v1213_v27 = vmul.f32 %v2139_v20, %v1212_v15 }
 0x336   : > { %v1548_v10 = vcombine.high %v1544_v12, %v1544_v12  ;;  %1561 = vst.msk [vmem:[%s2850_s23 + $0xc] sm:$0x1] %vm1557_vm11, %v1547_v14  ;;  %1563 = vst.msk [vmem:[%s2850_s23 + $0x14] sm:$0x1] %vm1557_vm11, %v1544_v12  ;;  %v1376_v24 = vmul.f32 0.0, %v2141_v57  ;;  %v1488_v58 = vmul.f32 %v2141_v57, %v1487_v53 }
 0x337   : > { %1564 = vst.msk [vmem:[%s2850_s23 + $0x18] sm:$0x1] %vm1557_vm11, %v1546_v13 }
 0x338   : > { %1565 = vst.msk [vmem:[%s2850_s23 + $0x1c] sm:$0x1] %vm1557_vm11, %v1548_v10 }
 0x3b5   : > { %v829_v19 = vpop.xlane.xlu1 %828 }
 0x3b6   : > { %v830_v21 = vadd.f32 %v829_v19, %v826_v17 }
 0x3b8   : > { %2142 = vrcp.f32 %v830_v21 }
 0x3b9   : > { %v1104_v22 = vpop.xlane.xlu0 %1103 }
 0x3ba   : > { %v1105_v39 = vadd.f32 %v1104_v22, %v1101_v49 }
 0x3bc   : > { %2144 = vrcp.f32 %v1105_v39 }
 0x3bd   : > { %v1379_v9 = vpop.xlane.xlu1 %1378 }
 0x3be   : > { %v1380_v18 = vadd.f32 %v1379_v9, %v1376_v24 }
 0x3c0   : > { %2146 = vrcp.f32 %v1380_v18 }
 0x3c5   : > { %v2143_v2 = vpop.eup %2142 }
 0x3c9   : > { %v2145_v42 = vpop.eup %2144 }
 0x3cd   : > { %v2147_v63 = vpop.eup %2146 }
 0x3eb   : > { %v932_v26 = vpop.f32.mrf.mxu0 }
 0x3ec   : > { %v939_v32 = vadd.f32 %v938_v25, %v932_v26 }
 0x3ed   : > { %v2024_v44 = vpop.f32.mrf.mxu0 }
 0x3ee   : > { %940 = vst.msk [vmem:[#allocation4 + $0x8] sm:$0xff] %vm381_vm0, %v939_v32 }
 0x3ef   : > { %v1207_v30 = vpop.f32.mrf.mxu0 }
 0x3f0   : > { %v1214_v31 = vadd.f32 %v1213_v27, %v1207_v30 }
 0x3f1   : > { %v2034_v33 = vpop.f32.mrf.mxu0 }
 0x3f2   : > { %1215 = vst.msk [vmem:[#allocation4 + $0x10] sm:$0xff] %vm381_vm0, %v1214_v31 }
 0x3f3   : > { %v1482_v34 = vpop.f32.mrf.mxu0 }
 0x3f4   : > { %v1489_v48 = vadd.f32 %v1488_v58, %v1482_v34 }
 0x3f5   : > { %v1568_v35 = vld [vmem:[#allocation4 + $0x8] sm:$0xff]  ;;  %v2044_v36 = vpop.f32.mrf.mxu0 }
 0x3f6   : > { %v1569_v37 = vmul.f32 %v2143_v2, %v1568_v35  ;;  %1490 = vst.msk [vmem:[#allocation4 + $0x18] sm:$0xff] %vm381_vm0, %v1489_v48 }
 0x3f8   : > { %v1571_v40 = vcombine.high %v1569_v37, %v1569_v37  ;;  %v1578_v38 = vrot.slane %v1569_v37, %v2831_v46 }
 0x3f9   : > { %v1638_v45 = vld [vmem:[#allocation4 + $0x10] sm:$0xff] }
 0x3fa   : > { %v1585_v47 = vrot.slane %v1571_v40, %v2831_v46  ;;  %v1586_v50 = vcombine.high %v1578_v38, %v1578_v38  ;;  %v1594_v51 = vrot.slane %v1578_v38, %v2831_v46  ;;  %v1639_v52 = vmul.f32 %v2145_v42, %v1638_v45 }
 0x3fc   : > { %v1587_v3 = vcombine.high %v1585_v47, %v1585_v47  ;;  %v1601_v59 = vrot.slane %v1585_v47, %v2831_v46  ;;  %v1608_v60 = vrot.slane %v1586_v50, %v2831_v46  ;;  %v1616_v61 = vcombine.high %v1594_v51, %v1594_v51  ;;  %1628 = vst.msk [vmem:[%s2850_s23 + $0x1] sm:$0x1] %vm1557_vm11, %v1594_v51 }
 0x3fd   : > { %v1641_v1 = vcombine.high %v1639_v52, %v1639_v52  ;;  %v1648_v28 = vrot.slane %v1639_v52, %v2831_v46  ;;  %v1708_v4 = vld [vmem:[#allocation4 + $0x18] sm:$0xff] }
 0x3fe   : > { %v1615_v5 = vrot.slane %v1587_v3, %v2831_v46  ;;  %v1617_v6 = vcombine.high %v1601_v59, %v1601_v59  ;;  %v1618_v7 = vcombine.high %v1608_v60, %v1608_v60  ;;  %1629 = vst.msk [vmem:[%s2850_s23 + $0x5] sm:$0x1] %vm1557_vm11, %v1608_v60  ;;  %1630 = vst.msk [vmem:[%s2850_s23 + $0x9] sm:$0x1] %vm1557_vm11, %v1616_v61 }
 0x3ff   : > { %1632 = vst.msk [vmem:[%s2850_s23 + $0x11] sm:$0x1] %vm1557_vm11, %v1601_v59  ;;  %v1709_v54 = vmul.f32 %v2147_v63, %v1708_v4  ;;  %v1655_v8 = vrot.slane %v1641_v1, %v2831_v46  ;;  %v1656_v11 = vcombine.high %v1648_v28, %v1648_v28  ;;  %v1664_v0 = vrot.slane %v1648_v28, %v2831_v46 }
 0x400   : > { %v1619_v12 = vcombine.high %v1615_v5, %v1615_v5  ;;  %1631 = vst.msk [vmem:[%s2850_s23 + $0xd] sm:$0x1] %vm1557_vm11, %v1618_v7  ;;  %1633 = vst.msk [vmem:[%s2850_s23 + $0x15] sm:$0x1] %vm1557_vm11, %v1615_v5 }
 0x401   : > { %1634 = vst.msk [vmem:[%s2850_s23 + $0x19] sm:$0x1] %vm1557_vm11, %v1617_v6  ;;  %v1711_v13 = vcombine.high %v1709_v54, %v1709_v54  ;;  %v1718_v14 = vrot.slane %v1709_v54, %v2831_v46  ;;  %v1657_v10 = vcombine.high %v1655_v8, %v1655_v8  ;;  %v1671_v29 = vrot.slane %v1655_v8, %v2831_v46 }
 0x402   : > { %v1678_v43 = vrot.slane %v1656_v11, %v2831_v46  ;;  %v1686_v16 = vcombine.high %v1664_v0, %v1664_v0  ;;  %1698 = vst.msk [vmem:[%s2850_s23 + $0x2] sm:$0x1] %vm1557_vm11, %v1664_v0  ;;  %1635 = vst.msk [vmem:[%s2850_s23 + $0x1d] sm:$0x1] %vm1557_vm11, %v1619_v12 }
 0x403   : > { %v1725_v56 = vrot.slane %v1711_v13, %v2831_v46  ;;  %v1726_v62 = vcombine.high %v1718_v14, %v1718_v14  ;;  %v1734_v55 = vrot.slane %v1718_v14, %v2831_v46  ;;  %v1685_v41 = vrot.slane %v1657_v10, %v2831_v46  ;;  %1702 = vst.msk [vmem:[%s2850_s23 + $0x12] sm:$0x1] %vm1557_vm11, %v1671_v29 }
 0x404   : > { %v1687_v19 = vcombine.high %v1671_v29, %v1671_v29  ;;  %v1688_v17 = vcombine.high %v1678_v43, %v1678_v43  ;;  %1699 = vst.msk [vmem:[%s2850_s23 + $0x6] sm:$0x1] %vm1557_vm11, %v1678_v43  ;;  %1700 = vst.msk [vmem:[%s2850_s23 + $0xa] sm:$0x1] %vm1557_vm11, %v1686_v16 }
 0x405   : > { %v1727_v20 = vcombine.high %v1725_v56, %v1725_v56  ;;  %v1741_v21 = vrot.slane %v1725_v56, %v2831_v46  ;;  %v1748_v22 = vrot.slane %v1726_v62, %v2831_v46  ;;  %v1756_v49 = vcombine.high %v1734_v55, %v1734_v55  ;;  %1768 = vst.msk [vmem:[%s2850_s23 + $0x3] sm:$0x1] %vm1557_vm11, %v1734_v55 }
 0x406   : > { %v1689_v57 = vcombine.high %v1685_v41, %v1685_v41  ;;  %1701 = vst.msk [vmem:[%s2850_s23 + $0xe] sm:$0x1] %vm1557_vm11, %v1688_v17  ;;  %1703 = vst.msk [vmem:[%s2850_s23 + $0x16] sm:$0x1] %vm1557_vm11, %v1685_v41 }
 0x407   : > { %1704 = vst.msk [vmem:[%s2850_s23 + $0x1a] sm:$0x1] %vm1557_vm11, %v1687_v19  ;;  %v1755_v23 = vrot.slane %v1727_v20, %v2831_v46  ;;  %v1757_v39 = vcombine.high %v1741_v21, %v1741_v21  ;;  %v1758_v9 = vcombine.high %v1748_v22, %v1748_v22  ;;  %1769 = vst.msk [vmem:[%s2850_s23 + $0x7] sm:$0x1] %vm1557_vm11, %v1748_v22 }
 0x408   : > { %1770 = vst.msk [vmem:[%s2850_s23 + $0xb] sm:$0x1] %vm1557_vm11, %v1756_v49  ;;  %1772 = vst.msk [vmem:[%s2850_s23 + $0x13] sm:$0x1] %vm1557_vm11, %v1741_v21 }
 0x409   : > { %1705 = vst.msk [vmem:[%s2850_s23 + $0x1e] sm:$0x1] %vm1557_vm11, %v1689_v57  ;;  %v1759_v46 = vcombine.high %v1755_v23, %v1755_v23  ;;  %1771 = vst.msk [vmem:[%s2850_s23 + $0xf] sm:$0x1] %vm1557_vm11, %v1758_v9 }
 0x40a   : > { %1773 = vst.msk [vmem:[%s2850_s23 + $0x17] sm:$0x1] %vm1557_vm11, %v1755_v23  ;;  %1774 = vst.msk [vmem:[%s2850_s23 + $0x1b] sm:$0x1] %vm1557_vm11, %v1757_v39 }
 0x40b   : > { %1775 = vst.msk [vmem:[%s2850_s23 + $0x1f] sm:$0x1] %vm1557_vm11, %v1759_v46 }
 0x40c   : > { %2245 = shalt.err (!%p2242_p1)
}
 0x40d   : > { %s2246_s14 = scalar_lea.hbm %s2943_s10, 512  ;;  %s2250_s22 = scalar_lea.hbm %s3005_s4, 1024 }
 0x40e   : > { %p2247_p2 = scmp.ne.s32.totalorder %s2943_s10, %s2246_s14  ;;  %p2251_p7 = scmp.lt.s32.totalorder %s2943_s10, %s3005_s4 }
 0x40f   : > { %p2252_p8 = scmp.lt.s32.totalorder %s2250_s22, %s2246_s14 }
 0x410   : > { %p2248_p5 = pnand %p2247_p2, %p2409_p9 }
 0x411   : > { %p2253_p0 = por %p2252_p8, %p2251_p7 }
 0x412   : > { %p2249_p6 = pneg %p2248_p5 }
 0x414   : > { %p2254_p3 = pnand %p2253_p0, %p2249_p6 }
 0x416   : > { %2257 = shalt.err (!%p2254_p3)
}
 0x417   : > { %s2327_s9 = smov 64   ;;  %s2328_s13 = smov 4  }
 0x418   : > { %2051 = dma.vmem_to_hbm [thread:$0]  (%p2409_p9), %s2945_s25, 512, %s2943_s10, %s1777_s12, %s2327_s9, %s2327_s9, %s2328_s13  }
 0x419 PF: > { %s1807_s1 = sand.u32 1, %s2296_s15   ;;  %p3027_p4 = scmp.ge.s32.totalorder %s2316_s20, 2 }
 0x41a   : > { %s1808_s23 = scalar_lea.sflag [#allocation7], %s1807_s1 }
 0x41b   : > { %p2064_p10 = pnand %p3027_p4, %p2416_p11 }
 0x41d   : > { %p2065_p13 = pneg %p2064_p10 }
 0x41f   : > { %2291 = dma.done.wait (%p2065_p13), %s1808_s23, 512  }
 0x420   : > { %2293 = vsyncadd (%p2065_p13), %s1808_s23, 4294966784  ;;  %s23_s20 = sadd.s32 1, %s2316_s20   ;;  %s3028_s28 = sld [smem:[#allocation17_spill]] }
 0x421   : > { %p20_p12 = scmp.ge.s32.totalorder %s23_s20, 4   ;;  %s3029_s18 = sld [smem:[#allocation15_spill]] }
 0x422   : > { %s3030_s19 = sld [smem:[#allocation16_spill]]  ;;  %s3031_s15 = smov %s2300_s16 }
 0x423   : > { %s3032_s16 = smov %s2304_s17  ;;  %22 = sbr.rel (!%p20_p12) target bundleno = 10 (0xa), region = 125 }
 0x426   : > { %s3033_s17 = smov %s3028_s28 }
 0x428   :  { %1813 = vsyncpa [#allocation6], 1 }
 0x429   :  { %1815 = vsyncpa [#allocation6 + $0x1], 1 }
 0x42a   :  { %1816 = vsyncpa [#allocation9], 1 }
 0x42b   :  { %1818 = vsyncpa [#allocation9 + $0x1], 1 }
 0x42c   :  { %1819 = vsyncpa [#allocation7], 1 }
 0x42d   :  { %1821 = vsyncpa [#allocation7 + $0x1], 1 }

</bundles_post_ra>
